<compile_context>
chip_gen: v5e
topology: v5e:2x2
jax: 0.10.0
libtpu: 0.0.40
codegen_flags: <defaults>
</compile_context>

<pallas_src>
import jax
import jax.numpy as jnp
from jax.experimental import pallas as pl
from jax.experimental.pallas import tpu as pltpu


_EPS = 1e-12  # torch.nn.functional.normalize clamp_min eps


def _round_up(x, m):
    return ((x + m - 1) // m) * m


def _make_kernel(num_channel):
    def kernel(w_ref, *refs):
        adj_refs = refs[:num_channel]
        o_ref = refs[num_channel]

        x = adj_refs[0][...].astype(jnp.float32)          # (tm, tn) VPU tile
        denom = jnp.abs(x)
        acc = x * w_ref[0]                                 # SMEM scalar weight
        for c in range(1, num_channel):                    # C is small: unroll
            x = adj_refs[c][...].astype(jnp.float32)
            denom = denom + jnp.abs(x)
            acc = acc + x * w_ref[c]

        denom = jnp.maximum(denom, _EPS)
        r = pl.reciprocal(denom, approx=True)              # EUP slot
        r = r * (2.0 - denom * r)                          # one Newton step
        o_ref[...] = (acc * r).astype(o_ref.dtype)
    return kernel


def _pick_tiles(R, Ncol, C, in_bytes, out_bytes):
    """Choose (tm, tn), padded shapes, grid steps and a VMEM limit."""
    try:
        vmem_cap = int(pltpu.get_tpu_info().vmem_capacity_bytes)
    except Exception:
        vmem_cap = 64 * 1024 * 1024                        # v7x-safe fallback
    budget = max(8 << 20, vmem_cap // 4)                   # ~25% of capacity

    # Column tile: 128-lane padded full width up to 2048 lanes (lane-dense vst).
    ncol_128 = _round_up(Ncol, 128)
    tn = ncol_128 if ncol_128 <= 2048 else 2048
    ncol_pad = _round_up(Ncol, tn)
    col_steps = ncol_pad // tn

    # Bytes per tile element: C double-buffered inputs + double-buffered output
    # + ~3 f32 temporaries (acc, denom, current channel) of compiler scratch.
    per_elem = 2 * C * in_bytes + 2 * out_bytes + 3 * 4
    max_elems = max(budget // per_elem, 8 * 128)

    tm = max((max_elems // tn) // 8 * 8, 8)
    r8 = _round_up(R, 8)
    tm = min(tm, r8)
    if col_steps == 1 and r8 > 8:
        # Guarantee >= 2 grid steps so both v7x TensorCores get work.
        tm = min(tm, max(_round_up(pl.cdiv(R, 2), 8), 8))
    r_pad = _round_up(R, tm)
    row_steps = r_pad // tm

    block_bytes = tm * tn * per_elem
    vmem_limit = int(min(max(block_bytes + (4 << 20), 32 << 20),
                         int(vmem_cap * 0.9)))
    return tm, tn, r_pad, ncol_pad, row_steps, col_steps, vmem_limit


def graph_channel_att(adj_list, weight):
    """adj_list: list/tuple of (R, Ncol) arrays (or a stacked (C, R, Ncol) array).
    weight: (C, 1, 1) learnable channel-attention parameter."""
    if isinstance(adj_list, (list, tuple)):
        channels = list(adj_list)
    else:
        channels = [adj_list[c] for c in range(adj_list.shape[0])]
    C = len(channels)
    R, Ncol = channels[0].shape
    in_dtype = channels[0].dtype
    # Matches PyTorch promotion: adj * softmax(f32 weight) -> f32 for bf16 adj.
    out_dtype = jnp.result_type(in_dtype, jnp.float32)

    # Tiny (C,)-length softmax of the channel weights: done in the wrapper,
    # passed to the kernel as SMEM scalars.
    w = jax.nn.softmax(weight.reshape(C).astype(jnp.float32), axis=0)

    tm, tn, r_pad, c_pad, row_steps, col_steps, vmem_limit = _pick_tiles(
        R, Ncol, C, jnp.dtype(in_dtype).itemsize, jnp.dtype(out_dtype).itemsize)

    if (r_pad, c_pad) != (R, Ncol):
        channels = [jnp.pad(x, ((0, r_pad - R), (0, c_pad - Ncol)))
                    for x in channels]

    adj_spec = pl.BlockSpec((tm, tn), lambda i, j: (i, j))
    out = pl.pallas_call(
        _make_kernel(C),
        out_shape=jax.ShapeDtypeStruct((r_pad, c_pad), out_dtype),
        grid=(row_steps, col_steps),
        in_specs=[pl.BlockSpec(memory_space=pltpu.MemorySpace.SMEM)]  # softmax(w)
                 + [adj_spec] * C,                                    # per-channel tiles
        out_specs=pl.BlockSpec((tm, tn), lambda i, j: (i, j)),
        compiler_params=pltpu.CompilerParams(
            dimension_semantics=("parallel", "parallel"),
            vmem_limit_bytes=vmem_limit),
    )(w, *channels)

    if (r_pad, c_pad) != (R, Ncol):
        out = out[:R, :Ncol]
    return out


def graph_channel_att_ref(adj_list, weight):
    """Pure-JAX reference mirroring the PyTorch forward."""
    adj = jnp.stack(adj_list).astype(jnp.float32)
    denom = jnp.maximum(jnp.sum(jnp.abs(adj), axis=0, keepdims=True), _EPS)
    adj_n = adj / denom
    w = jax.nn.softmax(weight.reshape(-1, 1, 1).astype(jnp.float32), axis=0)
    return jnp.sum(adj_n * w, axis=0)


if __name__ == "__main__":
    key = jax.random.PRNGKey(0)
    kadj, kw, kadj2, kw2 = jax.random.split(key, 4)

    # --- Case 1: aligned shapes (C adjacency channels over N nodes). ---
    C, N = 4, 256
    adj = jax.random.uniform(kadj, (C, N, N), dtype=jnp.float32)
    # Sparse-ish adjacencies; also positions where every channel is zero so the
    # clamp_min(eps) path of F.normalize is exercised.
    adj = jnp.where(adj > 0.5, adj, 0.0)
    adj = adj.at[:, :, N // 2:].set(0.0)
    weight = jax.random.normal(kw, (C, 1, 1), dtype=jnp.float32)
    adj_list = [adj[c] for c in range(C)]

    out = graph_channel_att(adj_list, weight)
    out = jax.block_until_ready(out)
    ref = graph_channel_att_ref(adj_list, weight)
    assert out.shape == (N, N)
    assert jnp.allclose(out, ref, atol=1e-5, rtol=1e-5)

    # --- Case 2: unaligned shapes (exercises row/column zero-padding path). ---
    C2, R2, Ncol2 = 3, 72, 200
    adj2 = jax.random.uniform(kadj2, (C2, R2, Ncol2), dtype=jnp.float32)
    adj2 = jnp.where(adj2 > 0.6, adj2, 0.0)
    weight2 = jax.random.normal(kw2, (C2, 1, 1), dtype=jnp.float32)
    adj_list2 = [adj2[c] for c in range(C2)]

    out2 = graph_channel_att(adj_list2, weight2)
    out2 = jax.block_until_ready(out2)
    ref2 = graph_channel_att_ref(adj_list2, weight2)
    assert out2.shape == (R2, Ncol2)
    assert jnp.allclose(out2, ref2, atol=1e-5, rtol=1e-5)

    print("KERNEL_OK")
</pallas_src>

<mosaic_0001>
module attributes {stable_mosaic.version = 11 : i64} {
  func.func @kernel(%arg0: i32, %arg1: i32, %arg2: memref<4xf32, #tpu.memory_space<smem>>, %arg3: memref<128x256xf32, #tpu.memory_space<vmem>>, %arg4: memref<128x256xf32, #tpu.memory_space<vmem>>, %arg5: memref<128x256xf32, #tpu.memory_space<vmem>>, %arg6: memref<128x256xf32, #tpu.memory_space<vmem>>, %arg7: memref<128x256xf32, #tpu.memory_space<vmem>>) attributes {dimension_semantics = [#tpu.dimension_semantics<parallel>, #tpu.dimension_semantics<parallel>], iteration_bounds = array<i64: 2, 1>, scalar_prefetch = 0 : i64, scratch_operands = 0 : i64, tpu.core_type = #tpu.core_type<tc>, window_params = [{transform_indices = @transform_0, window_bounds = array<i64: 4>}, {transform_indices = @transform_1, window_bounds = array<i64: 128, 256>}, {transform_indices = @transform_2, window_bounds = array<i64: 128, 256>}, {transform_indices = @transform_3, window_bounds = array<i64: 128, 256>}, {transform_indices = @transform_4, window_bounds = array<i64: 128, 256>}, {transform_indices = @transform_5, window_bounds = array<i64: 128, 256>}]} {
    %c0 = arith.constant 0 : index
    %c0_0 = arith.constant 0 : index
    %0 = vector.load %arg3[%c0, %c0_0] : memref<128x256xf32, #tpu.memory_space<vmem>>, vector<128x256xf32>
    %1 = math.absf %0 : vector<128x256xf32>
    %c0_1 = arith.constant 0 : index
    %2 = memref.load %arg2[%c0_1] : memref<4xf32, #tpu.memory_space<smem>>
    %3 = vector.broadcast %2 : f32 to vector<128x256xf32>
    %4 = arith.mulf %0, %3 : vector<128x256xf32>
    %c0_2 = arith.constant 0 : index
    %c0_3 = arith.constant 0 : index
    %5 = vector.load %arg4[%c0_2, %c0_3] : memref<128x256xf32, #tpu.memory_space<vmem>>, vector<128x256xf32>
    %6 = math.absf %5 : vector<128x256xf32>
    %7 = arith.addf %1, %6 : vector<128x256xf32>
    %c1 = arith.constant 1 : index
    %8 = memref.load %arg2[%c1] : memref<4xf32, #tpu.memory_space<smem>>
    %9 = vector.broadcast %8 : f32 to vector<128x256xf32>
    %10 = arith.mulf %5, %9 : vector<128x256xf32>
    %11 = arith.addf %4, %10 : vector<128x256xf32>
    %c0_4 = arith.constant 0 : index
    %c0_5 = arith.constant 0 : index
    %12 = vector.load %arg5[%c0_4, %c0_5] : memref<128x256xf32, #tpu.memory_space<vmem>>, vector<128x256xf32>
    %13 = math.absf %12 : vector<128x256xf32>
    %14 = arith.addf %7, %13 : vector<128x256xf32>
    %c2 = arith.constant 2 : index
    %15 = memref.load %arg2[%c2] : memref<4xf32, #tpu.memory_space<smem>>
    %16 = vector.broadcast %15 : f32 to vector<128x256xf32>
    %17 = arith.mulf %12, %16 : vector<128x256xf32>
    %18 = arith.addf %11, %17 : vector<128x256xf32>
    %c0_6 = arith.constant 0 : index
    %c0_7 = arith.constant 0 : index
    %19 = vector.load %arg6[%c0_6, %c0_7] : memref<128x256xf32, #tpu.memory_space<vmem>>, vector<128x256xf32>
    %20 = math.absf %19 : vector<128x256xf32>
    %21 = arith.addf %14, %20 : vector<128x256xf32>
    %c3 = arith.constant 3 : index
    %22 = memref.load %arg2[%c3] : memref<4xf32, #tpu.memory_space<smem>>
    %23 = vector.broadcast %22 : f32 to vector<128x256xf32>
    %24 = arith.mulf %19, %23 : vector<128x256xf32>
    %25 = arith.addf %18, %24 : vector<128x256xf32>
    %cst = arith.constant 9.99999996E-13 : f32
    %26 = vector.broadcast %cst : f32 to vector<128x256xf32>
    %27 = arith.maximumf %21, %26 : vector<128x256xf32>
    %28 = tpu.reciprocal %27 {approx = true} : vector<128x256xf32> -> vector<128x256xf32>
    %29 = arith.mulf %27, %28 : vector<128x256xf32>
    %cst_8 = arith.constant 2.000000e+00 : f32
    %30 = vector.broadcast %cst_8 : f32 to vector<128x256xf32>
    %31 = arith.subf %30, %29 : vector<128x256xf32>
    %32 = arith.mulf %28, %31 : vector<128x256xf32>
    %33 = arith.mulf %25, %32 : vector<128x256xf32>
    %c0_9 = arith.constant 0 : index
    %c0_10 = arith.constant 0 : index
    %34 = vector.load %arg7[%c0_9, %c0_10] : memref<128x256xf32, #tpu.memory_space<vmem>>, vector<128x256xf32>
    tpu.vector_store %arg7[%c0_9, %c0_10], %33 {strides = array<i32>} : memref<128x256xf32, #tpu.memory_space<vmem>>, vector<128x256xf32>,
    return
  }
  func.func @transform_0(%arg0: i32, %arg1: i32) -> i32 {
    %c0_i32 = arith.constant 0 : i32
    %c0_i32_0 = arith.constant 0 : i32
    return %c0_i32 : i32
  }
  func.func @transform_1(%arg0: i32, %arg1: i32) -> (i32, i32) {
    %c0_i32 = arith.constant 0 : i32
    return %arg0, %arg1 : i32, i32
  }
  func.func @transform_2(%arg0: i32, %arg1: i32) -> (i32, i32) {
    %c0_i32 = arith.constant 0 : i32
    return %arg0, %arg1 : i32, i32
  }
  func.func @transform_3(%arg0: i32, %arg1: i32) -> (i32, i32) {
    %c0_i32 = arith.constant 0 : i32
    return %arg0, %arg1 : i32, i32
  }
  func.func @transform_4(%arg0: i32, %arg1: i32) -> (i32, i32) {
    %c0_i32 = arith.constant 0 : i32
    return %arg0, %arg1 : i32, i32
  }
  func.func @transform_5(%arg0: i32, %arg1: i32) -> (i32, i32) {
    %c0_i32 = arith.constant 0 : i32
    return %arg0, %arg1 : i32, i32
  }
}

</mosaic_0001>

<bundles_post_ra>
// kernel: tpu_custom_call.1
= control target key start
LH: loop header
LB: loop body
LE: loop exit
PB: predicated region body
PF: predicated region fallthrough
CT: control target
= control target key end

     0   :  { %s2518_s0 = inlined_call_operand.hbm [shape: f32[4], index: 0, kind: input, shape index: {}]   ;;  %s2519_s1 = inlined_call_operand.hbm [shape: f32[256,256], index: 1, kind: input, shape index: {}]   ;;  %s2520_s2 = inlined_call_operand.hbm [shape: f32[256,256], index: 2, kind: input, shape index: {}]   ;;  %s2521_s3 = inlined_call_operand.hbm [shape: f32[256,256], index: 3, kind: input, shape index: {}]   ;;  %s2522_s4 = inlined_call_operand.hbm [shape: f32[256,256], index: 4, kind: input, shape index: {}]   ;;  %s2523_s5 = inlined_call_operand.hbm [shape: f32[256,256], index: 5, kind: output, shape index: {}]  }
   0x1   :  { %2533 = sst [smem:[#allocation23_spill]] %s2518_s0 }
   0x2   :  { %2534 = sst [smem:[#allocation24_spill]] %s2519_s1 }
   0x3   :  { %2535 = sst [smem:[#allocation25_spill]] %s2520_s2 }
   0x4   :  { %10 = vsyncpa [#allocation5], 0 }
   0x5   :  { %11 = vsyncpa [#allocation3], 0 }
   0x6   :  { %13 = vsyncpa [#allocation3 + $0x1], 0 }
   0x7   :  { %14 = vsyncpa [#allocation8], 0 }
   0x8   :  { %16 = vsyncpa [#allocation8 + $0x1], 0 }
   0x9   :  { %17 = vsyncpa [#allocation11], 0 }
   0xa   :  { %19 = vsyncpa [#allocation11 + $0x1], 0 }
   0xb   :  { %20 = vsyncpa [#allocation4], 0 }
   0xc   :  { %22 = vsyncpa [#allocation4 + $0x1], 0  ;;  %s1896_s18 = smov 0   ;;  %s1898_s19 = smov 0  }
   0xd   :  { %s1900_s20 = smov 0   ;;  %s1902_s21 = smov 0  }
   0xe   :  { %s1904_s22 = smov 0   ;;  %s1906_s23 = smov 0  }
   0xf LB: > { %2536 = sst [smem:[#allocation18_spill]] %s1847_s20  ;;  %s40_s24 = sadd.s32 1, %s1855_s22  ;;  %s1859_s23 = sphi %s1906_s23, %s28_s23   ;;  %s1855_s22 = sphi %s1904_s22, %s2555_s22   ;;  %s1851_s21 = sphi %s1902_s21, %s2554_s21   ;;  %s1847_s20 = sphi %s1900_s20, %s2553_s20   ;;  %s1843_s19 = sphi %s1898_s19, %s2557_s19   ;;  %s1839_s18 = sphi %s1896_s18, %s2556_s18  }
  0x10   : > { %2537 = sst [smem:[#allocation19_spill]] %s1855_s22  ;;  %s70_s25 = sadd.s32 1, %s1847_s20 }
  0x11   : > { %2538 = sst [smem:[#allocation20_spill]] %s1859_s23  ;;  %p42_p0 = scmp.ge.s32.totalorder %s40_s24, 2 }
  0x12   : > { %p77_p1 = scmp.ne.s32.totalorder %s1847_s20, %s1843_s19  ;;  %p78_p2 = scmp.eq.s32.totalorder %s1859_s23, 0 }
  0x13   : > { %p1431_p3 = scmp.ge.s32.totalorder %s1859_s23, 2  ;;  %s2559_s24 = smov (%p42_p0, %s40_s24), 0 }
  0x14   : > { %2539 = sst [smem:[#allocation21_spill]] %s2559_s24  ;;  %p79_p4 = por %p78_p2, %p77_p1 }
  0x15   : > { %p1510_p5 = scmp.lt.s32.totalorder %s1859_s23, 2  ;;  %s65_s26 = ssub.s32 %s1855_s22, %s2559_s24 }
  0x16   : > { %s1941_s27 = sand.u32 1, %s1847_s20   ;;  %p68_p6 = scmp.eq.s32.totalorder %s65_s26, 0 }
  0x17   : > { %s1944_s28 = sshll.u32 %s1941_s27, 8  ;;  %s1947_s29 = sshll.u32 %s1855_s22, 8 }
  0x18   : > { %p1949_p7 = pnand %p1510_p5, %p79_p4  ;;  %s254_s7 = sand.u32 1, %s1859_s23  }
  0x19   : > { %s1954_s6 = scalar_select %p68_p6, %s1847_s20, %s70_s25  }
  0x1a   : > { %s2542_s2 = sld [smem:[#allocation25_spill]]  ;;  %s258_s11 = scalar_lea.vmem [#allocation7], %s1944_s28 }
  0x1b   : > { %2541 = sst [smem:[#allocation22_spill]] %s1954_s6  ;;  %s269_s12 = sshll.u32 %s258_s11, 4  ;;  %s270_s12 = int_to_ptr.vmem [resolvable:$true] %s269_s12 }
  0x1c   : > { %s1962_s14 = scalar_lea.sflag [#allocation8], %s254_s7  ;;  %s2524_s15 = smov 256  }
  0x1d   : > { %s2526_s16 = smov 16   ;;  %s1971_s17 = sadd.s32 4294967295, %s1859_s23  }
  0x1e   : > { %s1428_s25 = sadd.s32 4294967294, %s1859_s23   ;;  %p83_p8 = scmp.ne.s32.totalorder %s1843_s19, %s1839_s18 }
  0x1f   : > { %p84_p9 = scmp.eq.s32.totalorder %s1971_s17, 0  ;;  %p193_p10 = scmp.eq.s32.totalorder %s1971_s17, 1 }
  0x20   : > { %s266_s10 = scalar_lea.hbm %s2542_s2, %s1947_s29  ;;  %p199_p11 = scmp.eq.s32.totalorder %s1428_s25, 1 }
  0x21   : > { %s267_s13 = sshll.u32 %s266_s10, 4  ;;  %p1429_p12 = scmp.ge.s32.totalorder %s1859_s23, 1  ;;  %s268_s13 = int_to_ptr.hbm [resolvable:$true] %s267_s13 }
  0x22   : > { %1498 = dma.hbm_to_vmem [thread:$0]  (!%p1949_p7), %s268_s13, 4096, %s270_s12, %s1962_s14, %s2524_s15, %s2524_s15, %s2526_s16  }
  0x23   : > { %p1981_p13 = por %p84_p9, %p83_p8  ;;  %p1988_p0 = por %p193_p10, %p77_p1 }
  0x24   : > { %p1992_p2 = por %p199_p11, %p83_p8  ;;  %p206_p4 = scmp.lt.s32.totalorder %s1859_s23, 3 }
  0x25   : > { %s2546_s0 = sld [smem:[#allocation23_spill]]  ;;  %s233_s16 = scalar_lea.vmem [#allocation6], %s1944_s28 }
  0x26   : > { %p2000_p5 = pnand %p1429_p12, %p206_p4  ;;  %s2548_s1 = sld [smem:[#allocation24_spill]] }
  0x27   : > { %s244_s2 = sshll.u32 %s233_s16, 4  ;;  %s1863_s10 = smov [#allocation2]   ;;  %s245_s2 = int_to_ptr.vmem [resolvable:$true] %s244_s2 }
  0x28   : > { %p1488_p1 = pneg %p2000_p5  ;;  %s2549_s24 = smov 16  }
  0x29   : > { %s2550_s22 = smov 256   ;;  %s291_s16 = scalar_lea.hbm %s2521_s3, %s1947_s29 }
  0x2a   : > { %p1489_p6 = pnand %p1488_p1, %p84_p9  ;;  %s316_s20 = scalar_lea.hbm %s2522_s4, %s1947_s29 }
  0x2b   : > { %s218_s11 = sshll.u32 %s2546_s0, 4  ;;  %s230_s0 = scalar_lea.sflag [#allocation3], %s1941_s27  ;;  %s219_s11 = int_to_ptr.hbm [resolvable:$true] %s218_s11 }
  0x2c   : > { %s241_s15 = scalar_lea.hbm %s2548_s1, %s1947_s29  ;;  %s283_s1 = scalar_lea.vmem [#allocation9], %s1944_s28 }
  0x2d   : > { %s242_s9 = sshll.u32 %s241_s15, 4  ;;  %s294_s6 = sshll.u32 %s283_s1, 4  ;;  %s243_s9 = int_to_ptr.hbm [resolvable:$true] %s242_s9  ;;  %s295_s6 = int_to_ptr.vmem [resolvable:$true] %s294_s6 }
  0x2e   : > { %1491 = dma.hbm_to_smem (!%p1489_p6), %s219_s11, 16, %s1863_s10, [#allocation5]  }
  0x2f   : > { %1495 = dma.hbm_to_vmem [thread:$0]  (!%p1949_p7), %s243_s9, 4096, %s245_s2, %s230_s0, %s2550_s22, %s2550_s22, %s2549_s24  }
  0x30   : > { %s292_s15 = sshll.u32 %s291_s16, 4  ;;  %s317_s23 = sshll.u32 %s316_s20, 4  ;;  %s293_s15 = int_to_ptr.hbm [resolvable:$true] %s292_s15  ;;  %s318_s23 = int_to_ptr.hbm [resolvable:$true] %s317_s23 }
  0x31   : > { %1501 = dma.hbm_to_vmem [thread:$0]  (!%p1949_p7), %s293_s15, 4096, %s295_s6, %s1962_s14, %s2550_s22, %s2550_s22, %s2549_s24  }
  0x32   : > { %s308_s0 = scalar_lea.vmem [#allocation10], %s1944_s28  ;;  %s305_s9 = scalar_lea.sflag [#allocation11], %s1941_s27 }
  0x33   : > { %s319_s2 = sshll.u32 %s308_s0, 4  ;;  %331 = sbr.rel (%p2000_p5) target bundleno = 250 (0xfa), region = 40  ;;  %s320_s2 = int_to_ptr.vmem [resolvable:$true] %s319_s2 }
  0x34   : > { %1504 = dma.hbm_to_vmem [thread:$0]  (!%p1949_p7), %s318_s23, 4096, %s320_s2, %s305_s9, %s2550_s22, %s2550_s22, %s2549_s24  }
  0x38   : > { %1818 = dma.done.wait (%p84_p9), [#allocation5], 16  }
  0x39   : > { %1820 = vsyncadd (%p84_p9), [#allocation5], 4294967280  ;;  %s2048_s1 = sand.u32 1, %s1843_s19  }
  0x3a   : > { %s2051_s20 = sshll.u32 %s2048_s1, 8  ;;  %s339_s27 = scalar_lea.sflag [#allocation3], %s2048_s1 }
  0x3b   : > { %s2055_s22 = scalar_lea.vmem [#allocation6], %s2051_s20 }
  0x3c   : > { %1822 = dma.done.wait (%p1981_p13), %s339_s27, 4096  }
  0x3d   : > { %1824 = vsyncadd (%p1981_p13), %s339_s27, 4294963200  ;;  %s348_s23 = sand.u32 1, %s1971_s17   ;;  %s2063_s28 = scalar_lea.vmem [#allocation7], %s2051_s20 }
  0x3e   : > { %s349_s24 = scalar_lea.sflag [#allocation8], %s348_s23 }
  0x3f   : > { %1826 = dma.done.wait (%p1981_p13), %s349_s24, 8192  }
  0x40   : > { %1828 = vsyncadd (%p1981_p13), %s349_s24, 4294959104  ;;  %s2070_s29 = scalar_lea.vmem [#allocation9], %s2051_s20  ;;  %s369_s30 = scalar_lea.sflag [#allocation11], %s2048_s1 }
  0x41   : > { %s2074_s6 = scalar_lea.vmem [#allocation10], %s2051_s20 }
  0x42   : > { %1830 = dma.done.wait (%p1981_p13), %s369_s30, 4096  }
  0x43   : > { %1832 = vsyncadd (%p1981_p13), %s369_s30, 4294963200 }
  0x44   : > { %378 = sfence }
  0x45   : > { %v426_v0 = vld [vmem:[%s2055_s22] sm:$0xff]  ;;  %s490_s14 = sld [smem:[#allocation2]]  ;;  %v427_v7 = vld [vmem:[%s2055_s22 + $0x8] sm:$0xff]  ;;  %v428_v27 = vld [vmem:[%s2055_s22 + $0x10] sm:$0xff]  ;;  %s2131_s13 = scalar_lea.vmem [#allocation12], %s2051_s20 }
  0x46   : > { %v524_v1 = vld [vmem:[%s2063_s28] sm:$0xff]  ;;  %v458_v3 = vand.u32 2147483647, %v426_v0  ;;  %s1455_s17 = sld [smem:[#allocation2 + $0x1]]  ;;  %v459_v10 = vand.u32 2147483647, %v427_v7 }
  0x47   : > { %v686_v2 = vld [vmem:[%s2070_s29] sm:$0xff]  ;;  %v556_v4 = vand.u32 2147483647, %v524_v1  ;;  %s1456_s12 = sld [smem:[#allocation2 + $0x2]]  ;;  %v525_v11 = vld [vmem:[%s2063_s28 + $0x8] sm:$0xff]  ;;  %v526_v29 = vld [vmem:[%s2063_s28 + $0x10] sm:$0xff] }
  0x48   : > { %v718_v5 = vand.u32 2147483647, %v686_v2  ;;  %v848_v6 = vld [vmem:[%s2074_s6] sm:$0xff]  ;;  %s1457_s26 = sld [smem:[#allocation2 + $0x3]]  ;;  %v687_v12 = vld [vmem:[%s2070_s29 + $0x8] sm:$0xff]  ;;  %v688_v32 = vld [vmem:[%s2070_s29 + $0x10] sm:$0xff] }
  0x49   : > { %v588_v8 = vadd.f32 %v556_v4, %v458_v3  ;;  %v880_v9 = vand.u32 2147483647, %v848_v6  ;;  %v849_v13 = vld [vmem:[%s2074_s6 + $0x8] sm:$0xff]  ;;  %v557_v15 = vand.u32 2147483647, %v525_v11  ;;  %v850_v36 = vld [vmem:[%s2074_s6 + $0x10] sm:$0xff] }
  0x4a   : > { %v719_v17 = vand.u32 2147483647, %v687_v12  ;;  %v881_v18 = vand.u32 2147483647, %v849_v13  ;;  %v460_v35 = vand.u32 2147483647, %v428_v27 }
  0x4b   : > { %v750_v14 = vadd.f32 %v718_v5, %v588_v8  ;;  %v2088_v16 = vstv %s490_s14  ;;  %v589_v25 = vadd.f32 %v557_v15, %v459_v10  ;;  %v558_v40 = vand.u32 2147483647, %v526_v29  ;;  %v429_v41 = vld [vmem:[%s2055_s22 + $0x18] sm:$0xff]  ;;  %v430_v58 = vld [vmem:[%s2055_s22 + $0x20] sm:$0xff]  ;;  %s1473_s25 = sshll.u32 %s1851_s21, 8  ;;  %s1250_s21 = sshll.u32 %s2131_s13, 4  ;;  %s1251_s21 = int_to_ptr.vmem [resolvable:$true] %s1250_s21 }
  0x4c   : > { %v492_v19 = vmul.f32 %v2088_v16, %v426_v0  ;;  %v2091_v20 = vstv %s1455_s17  ;;  %v493_v22 = vmul.f32 %v2088_v16, %v427_v7  ;;  %v720_v43 = vand.u32 2147483647, %v688_v32  ;;  %v527_v44 = vld [vmem:[%s2063_s28 + $0x18] sm:$0xff]  ;;  %s1249_s11 = scalar_lea.hbm %s2523_s5, %s1473_s25  ;;  %s1235_s0 = scalar_lea.sflag [#allocation4], %s2048_s1 }
  0x4d   : > { %v912_v21 = vadd.f32 %v880_v9, %v750_v14  ;;  %v622_v23 = vmul.f32 %v2091_v20, %v524_v1  ;;  %v2095_v24 = vstv %s1456_s12  ;;  %v623_v26 = vmul.f32 %v2091_v20, %v525_v11  ;;  %v689_v49 = vld [vmem:[%s2070_s29 + $0x18] sm:$0xff]  ;;  %v528_v1 = vld [vmem:[%s2063_s28 + $0x20] sm:$0xff]  ;;  %s1252_s10 = sshll.u32 %s1249_s11, 4  ;;  %s1253_s10 = int_to_ptr.hbm [resolvable:$true] %s1252_s10 }
  0x4e   : > { %v2100_v30 = vstv %s1457_s26  ;;  %v751_v31 = vadd.f32 %v719_v17, %v589_v25  ;;  %v784_v34 = vmul.f32 %v2095_v24, %v686_v2  ;;  %v785_v38 = vmul.f32 %v2095_v24, %v687_v12  ;;  %v851_v54 = vld [vmem:[%s2074_s6 + $0x18] sm:$0xff]  ;;  %v690_v2 = vld [vmem:[%s2070_s29 + $0x20] sm:$0xff]  ;;  %v431_v17 = vld [vmem:[%s2055_s22 + $0x28] sm:$0xff]  ;;  %s1779_s2 = sshra.s32 %s1253_s10, 4  ;;  %s1780_s2 = int_to_ptr.hbm [resolvable:$true] %s1779_s2 }
  0x4f   : > { %v1010_v28 = vmax.f32 %v912_v21, 1e-12  ;;  %v654_v33 = vadd.f32 %v622_v23, %v492_v19  ;;  %v655_v37 = vadd.f32 %v623_v26, %v493_v22  ;;  %v946_v42 = vmul.f32 %v2100_v30, %v848_v6  ;;  %v852_v11 = vld [vmem:[%s2074_s6 + $0x20] sm:$0xff]  ;;  %s1781_s9 = scalar_lea.hbm %s1780_s2, 256  ;;  %p1786_p10 = scmp.lt.s32.totalorder %s1780_s2, %s2523_s5 }
  0x50   : > { %v913_v39 = vadd.f32 %v881_v18, %v751_v31  ;;  %v947_v45 = vmul.f32 %v2100_v30, %v849_v13  ;;  %v590_v47 = vadd.f32 %v558_v40, %v460_v35  ;;  %v882_v48 = vand.u32 2147483647, %v850_v36  ;;  %p1782_p7 = scmp.ne.s32.totalorder %s1780_s2, %s1781_s9 }
  0x51   : > { %1566 = vrcp.f32 %v1010_v28  ;;  %v816_v50 = vadd.f32 %v784_v34, %v654_v33  ;;  %v494_v51 = vmul.f32 %v2088_v16, %v428_v27  ;;  %v624_v52 = vmul.f32 %v2091_v20, %v526_v29  ;;  %v691_v29 = vld [vmem:[%s2070_s29 + $0x28] sm:$0xff] }
  0x52   : > { %v1011_v46 = vmax.f32 %v913_v39, 1e-12  ;;  %v461_v53 = vand.u32 2147483647, %v429_v41  ;;  %v817_v55 = vadd.f32 %v785_v38, %v655_v37  ;;  %v752_v56 = vadd.f32 %v720_v43, %v590_v47  ;;  %v2128_v39 = vld [vmem:[%s2074_s6 + $0x28] sm:$0xff]  ;;  %v432_v43 = vld [vmem:[%s2055_s22 + $0x30] sm:$0xff]  ;;  %p1783_p8 = pnand %p1782_p7, %p1988_p0 }
  0x53   : > { %v559_v57 = vand.u32 2147483647, %v527_v44  ;;  %v721_v60 = vand.u32 2147483647, %v689_v49  ;;  %v883_v0 = vand.u32 2147483647, %v851_v54  ;;  %v978_v3 = vadd.f32 %v946_v42, %v816_v50 }
  0x54   : > { %1568 = vrcp.f32 %v1011_v46  ;;  %v914_v62 = vadd.f32 %v882_v48, %v752_v56  ;;  %v656_v4 = vadd.f32 %v624_v52, %v494_v51  ;;  %v786_v5 = vmul.f32 %v2095_v24, %v688_v32  ;;  %v530_v48 = vld [vmem:[%s2063_s28 + $0x30] sm:$0xff]  ;;  %p1784_p9 = pneg %p1783_p8 }
  0x55   : > { %v591_v63 = vadd.f32 %v559_v57, %v461_v53  ;;  %v462_v6 = vand.u32 2147483647, %v430_v58  ;;  %v979_v8 = vadd.f32 %v947_v45, %v817_v55  ;;  %v495_v12 = vmul.f32 %v2088_v16, %v429_v41  ;;  %v692_v55 = vld [vmem:[%s2070_s29 + $0x30] sm:$0xff] }
  0x56   : > { %v1012_v9 = vmax.f32 %v914_v62, 1e-12  ;;  %v625_v13 = vmul.f32 %v2091_v20, %v527_v44  ;;  %v560_v14 = vand.u32 2147483647, %v528_v1  ;;  %v722_v15 = vand.u32 2147483647, %v690_v2 }
  0x57   : > { %v1567_v59 = vpop.eup %1566  ;;  %v753_v10 = vadd.f32 %v721_v60, %v591_v63  ;;  %v948_v21 = vmul.f32 %v2100_v30, %v850_v36  ;;  %v818_v25 = vadd.f32 %v786_v5, %v656_v4  ;;  %v884_v27 = vand.u32 2147483647, %v852_v11  ;;  %v854_v63 = vld [vmem:[%s2074_s6 + $0x30] sm:$0xff]  ;;  %v433_v4 = vld [vmem:[%s2055_s22 + $0x38] sm:$0xff] }
  0x58   : > { %v1074_v61 = vmul.f32 %v1567_v59, %v1010_v28  ;;  %1570 = vrcp.f32 %v1012_v9  ;;  %v592_v26 = vadd.f32 %v560_v14, %v462_v6  ;;  %v529_v28 = vld [vmem:[%s2063_s28 + $0x28] sm:$0xff]  ;;  %v787_v32 = vmul.f32 %v2095_v24, %v689_v49  ;;  %v531_v14 = vld [vmem:[%s2063_s28 + $0x38] sm:$0xff] }
  0x59   : > { %v915_v22 = vadd.f32 %v883_v0, %v753_v10  ;;  %v463_v34 = vand.u32 2147483647, %v431_v17  ;;  %v657_v37 = vadd.f32 %v625_v13, %v495_v12  ;;  %v496_v36 = vmul.f32 %v2088_v16, %v430_v58 }
  0x5a   : > { %v1106_v7 = vsub.f32 2.0, %v1074_v61  ;;  %v1569_v18 = vpop.eup %1568  ;;  %v754_v38 = vadd.f32 %v722_v15, %v592_v26  ;;  %v626_v40 = vmul.f32 %v2091_v20, %v528_v1  ;;  %v561_v41 = vand.u32 2147483647, %v529_v28 }
  0x5b   : > { %v1075_v23 = vmul.f32 %v1569_v18, %v1011_v46  ;;  %v1013_v33 = vmax.f32 %v915_v22, 1e-12  ;;  %v723_v42 = vand.u32 2147483647, %v691_v29  ;;  %v980_v45 = vadd.f32 %v948_v21, %v818_v25  ;;  %v693_v21 = vld [vmem:[%s2070_s29 + $0x38] sm:$0xff] }
  0x5c   : > { %v1138_v19 = vmul.f32 %v1567_v59, %v1106_v7  ;;  %v949_v46 = vmul.f32 %v2100_v30, %v851_v54  ;;  %v916_v47 = vadd.f32 %v884_v27, %v754_v38  ;;  %v497_v50 = vmul.f32 %v2088_v16, %v431_v17 }
  0x5d   : > { %v1107_v35 = vsub.f32 2.0, %v1075_v23  ;;  %1572 = vrcp.f32 %v1013_v33  ;;  %v593_v51 = vadd.f32 %v561_v41, %v463_v34  ;;  %v627_v52 = vmul.f32 %v2091_v20, %v529_v28 }
  0x5e   : > { %v1170_v31 = vmul.f32 %v1138_v19, %v978_v3  ;;  %v1571_v49 = vpop.eup %1570  ;;  %v885_v53 = vand.u32 2147483647, %v2128_v39  ;;  %v1014_v58 = vmax.f32 %v916_v47, 1e-12  ;;  %v464_v59 = vand.u32 2147483647, %v432_v43 }
  0x5f   : > { %v1139_v44 = vmul.f32 %v1569_v18, %v1107_v35  ;;  %v1076_v57 = vmul.f32 %v1571_v49, %v1012_v9  ;;  %v658_v60 = vadd.f32 %v626_v40, %v496_v36  ;;  %v788_v54 = vmul.f32 %v2095_v24, %v690_v2 }
  0x60   : > { %1202 = vst [vmem:[%s2131_s13] sm:$0xff] %v1170_v31  ;;  %v755_v61 = vadd.f32 %v723_v42, %v593_v51  ;;  %v562_v62 = vand.u32 2147483647, %v530_v48  ;;  %v819_v1 = vadd.f32 %v787_v32, %v657_v37  ;;  %1574 = vrcp.f32 %v1014_v58  ;;  %v434_v31 = vld [vmem:[%s2055_s22 + $0x40] sm:$0xff] }
  0x61   : > { %v1171_v56 = vmul.f32 %v1139_v44, %v979_v8  ;;  %v1108_v0 = vsub.f32 2.0, %v1076_v57  ;;  %v724_v3 = vand.u32 2147483647, %v692_v55  ;;  %v950_v6 = vmul.f32 %v2100_v30, %v852_v11  ;;  %v532_v42 = vld [vmem:[%s2063_s28 + $0x40] sm:$0xff] }
  0x62   : > { %v789_v7 = vmul.f32 %v2095_v24, %v691_v29  ;;  %v917_v8 = vadd.f32 %v885_v53, %v755_v61  ;;  %v594_v9 = vadd.f32 %v562_v62, %v464_v59  ;;  %v659_v12 = vadd.f32 %v627_v52, %v497_v50  ;;  %v2153_v29 = vld [vmem:[%s2074_s6 + $0x38] sm:$0xff]  ;;  %v856_v50 = vld [vmem:[%s2074_s6 + $0x40] sm:$0xff] }
  0x63   : > { %1203 = vst [vmem:[%s2131_s13 + $0x8] sm:$0xff] %v1171_v56  ;;  %v1573_v5 = vpop.eup %1572  ;;  %v1140_v10 = vmul.f32 %v1571_v49, %v1108_v0  ;;  %v886_v13 = vand.u32 2147483647, %v854_v63  ;;  %v820_v15 = vadd.f32 %v788_v54, %v658_v60  ;;  %v465_v19 = vand.u32 2147483647, %v433_v4  ;;  %v435_v56 = vld [vmem:[%s2055_s22 + $0x48] sm:$0xff] }
  0x64   : > { %v1077_v2 = vmul.f32 %v1573_v5, %v1013_v33  ;;  %v1015_v17 = vmax.f32 %v917_v8, 1e-12  ;;  %v756_v18 = vadd.f32 %v724_v3, %v594_v9  ;;  %v981_v23 = vadd.f32 %v949_v46, %v819_v1  ;;  %v533_v1 = vld [vmem:[%s2063_s28 + $0x48] sm:$0xff] }
  0x65   : > { %v1172_v22 = vmul.f32 %v1140_v10, %v980_v45  ;;  %v498_v25 = vmul.f32 %v2088_v16, %v432_v43  ;;  %v628_v26 = vmul.f32 %v2091_v20, %v530_v48  ;;  %v563_v28 = vand.u32 2147483647, %v531_v14  ;;  %v694_v43 = vld [vmem:[%s2070_s29 + $0x40] sm:$0xff]  ;;  %v2171_v3 = vld [vmem:[%s2070_s29 + $0x48] sm:$0xff] }
  0x66   : > { %v1109_v11 = vsub.f32 2.0, %v1077_v2  ;;  %1576 = vrcp.f32 %v1015_v17  ;;  %v918_v27 = vadd.f32 %v886_v13, %v756_v18  ;;  %v1575_v32 = vpop.eup %1574  ;;  %v821_v34 = vadd.f32 %v789_v7, %v659_v12  ;;  %v2176_v2 = vld [vmem:[%s2074_s6 + $0x48] sm:$0xff] }
  0x67   : > { %1204 = vst [vmem:[%s2131_s13 + $0x10] sm:$0xff] %v1172_v22  ;;  %v951_v35 = vmul.f32 %v2100_v30, %v2128_v39  ;;  %v725_v37 = vand.u32 2147483647, %v693_v21  ;;  %v982_v36 = vadd.f32 %v950_v6, %v820_v15  ;;  %v1078_v38 = vmul.f32 %v1575_v32, %v1014_v58  ;;  %v436_v22 = vld [vmem:[%s2055_s22 + $0x50] sm:$0xff] }
  0x68   : > { %v1141_v33 = vmul.f32 %v1573_v5, %v1109_v11  ;;  %v1016_v40 = vmax.f32 %v918_v27, 1e-12  ;;  %v595_v41 = vadd.f32 %v563_v28, %v465_v19  ;;  %v790_v45 = vmul.f32 %v2095_v24, %v692_v55 }
  0x69   : > { %v887_v46 = vand.u32 2147483647, %v2153_v29  ;;  %v466_v47 = vand.u32 2147483647, %v434_v31  ;;  %v1110_v48 = vsub.f32 2.0, %v1078_v38  ;;  %v660_v49 = vadd.f32 %v628_v26, %v498_v25  ;;  %v534_v26 = vld [vmem:[%s2063_s28 + $0x50] sm:$0xff] }
  0x6a   : > { %v1173_v44 = vmul.f32 %v1141_v33, %v981_v23  ;;  %1578 = vrcp.f32 %v1016_v40  ;;  %v757_v39 = vadd.f32 %v725_v37, %v595_v41  ;;  %v983_v51 = vadd.f32 %v951_v35, %v821_v34  ;;  %v696_v33 = vld [vmem:[%s2070_s29 + $0x50] sm:$0xff] }
  0x6b   : > { %v564_v52 = vand.u32 2147483647, %v532_v42  ;;  %v726_v53 = vand.u32 2147483647, %v694_v43  ;;  %v1142_v58 = vmul.f32 %v1575_v32, %v1110_v48  ;;  %v952_v59 = vmul.f32 %v2100_v30, %v854_v63 }
  0x6c   : > { %1205 = vst [vmem:[%s2131_s13 + $0x18] sm:$0xff] %v1173_v44  ;;  %v1577_v57 = vpop.eup %1576  ;;  %v499_v55 = vmul.f32 %v2088_v16, %v433_v4  ;;  %v919_v60 = vadd.f32 %v887_v46, %v757_v39  ;;  %v629_v61 = vmul.f32 %v2091_v20, %v531_v14  ;;  %v888_v0 = vand.u32 2147483647, %v856_v50  ;;  %v437_v44 = vld [vmem:[%s2055_s22 + $0x58] sm:$0xff] }
  0x6d   : > { %v1079_v54 = vmul.f32 %v1577_v57, %v1015_v17  ;;  %v596_v62 = vadd.f32 %v564_v52, %v466_v47  ;;  %v1174_v5 = vmul.f32 %v1142_v58, %v982_v36  ;;  %v822_v6 = vadd.f32 %v790_v45, %v660_v49  ;;  %v535_v52 = vld [vmem:[%s2063_s28 + $0x58] sm:$0xff] }
  0x6e   : > { %v1017_v7 = vmax.f32 %v919_v60, 1e-12  ;;  %v467_v8 = vand.u32 2147483647, %v435_v56  ;;  %v791_v63 = vmul.f32 %v2095_v24, %v693_v21  ;;  %v500_v4 = vmul.f32 %v2088_v16, %v434_v31 }
  0x6f   : > { %v1111_v9 = vsub.f32 2.0, %v1079_v54  ;;  %v758_v10 = vadd.f32 %v726_v53, %v596_v62  ;;  %1206 = vst [vmem:[%s2131_s13 + $0x20] sm:$0xff] %v1174_v5  ;;  %v630_v13 = vmul.f32 %v2091_v20, %v532_v42  ;;  %v565_v14 = vand.u32 2147483647, %v533_v1  ;;  %v858_v42 = vld [vmem:[%s2074_s6 + $0x50] sm:$0xff]  ;;  %v2196_v53 = vld [vmem:[%s2070_s29 + $0x58] sm:$0xff] }
  0x70   : > { %v1579_v12 = vpop.eup %1578  ;;  %1580 = vrcp.f32 %v1017_v7  ;;  %v727_v15 = vand.u32 2147483647, %v2171_v3  ;;  %v661_v19 = vadd.f32 %v629_v61, %v499_v55  ;;  %v984_v23 = vadd.f32 %v952_v59, %v822_v6  ;;  %v2201_v61 = vld [vmem:[%s2074_s6 + $0x58] sm:$0xff]  ;;  %v438_v5 = vld [vmem:[%s2055_s22 + $0x60] sm:$0xff] }
  0x71   : > { %v1143_v17 = vmul.f32 %v1577_v57, %v1111_v9  ;;  %v1080_v18 = vmul.f32 %v1579_v12, %v1016_v40  ;;  %v920_v21 = vadd.f32 %v888_v0, %v758_v10  ;;  %v597_v11 = vadd.f32 %v565_v14, %v467_v8  ;;  %v536_v14 = vld [vmem:[%s2063_s28 + $0x60] sm:$0xff] }
  0x72   : > { %v889_v25 = vand.u32 2147483647, %v2176_v2  ;;  %v953_v31 = vmul.f32 %v2100_v30, %v2153_v29  ;;  %v662_v34 = vadd.f32 %v630_v13, %v500_v4  ;;  %v792_v35 = vmul.f32 %v2095_v24, %v694_v43 }
  0x73   : > { %v1175_v27 = vmul.f32 %v1143_v17, %v983_v51  ;;  %v1112_v28 = vsub.f32 2.0, %v1080_v18  ;;  %v1018_v32 = vmax.f32 %v920_v21, 1e-12  ;;  %v759_v37 = vadd.f32 %v727_v15, %v597_v11  ;;  %v698_v15 = vld [vmem:[%s2070_s29 + $0x60] sm:$0xff] }
  0x74   : > { %v468_v36 = vand.u32 2147483647, %v436_v22  ;;  %v823_v40 = vadd.f32 %v791_v63, %v661_v19  ;;  %v566_v41 = vand.u32 2147483647, %v534_v26  ;;  %v954_v29 = vmul.f32 %v2100_v30, %v856_v50 }
  0x75   : > { %1207 = vst [vmem:[%s2131_s13 + $0x28] sm:$0xff] %v1175_v27  ;;  %v1144_v38 = vmul.f32 %v1579_v12, %v1112_v28  ;;  %1582 = vrcp.f32 %v1018_v32  ;;  %v501_v46 = vmul.f32 %v2088_v16, %v435_v56  ;;  %v921_v47 = vadd.f32 %v889_v25, %v759_v37  ;;  %v860_v25 = vld [vmem:[%s2074_s6 + $0x60] sm:$0xff] }
  0x76   : > { %v1581_v45 = vpop.eup %1580  ;;  %v728_v48 = vand.u32 2147483647, %v696_v33  ;;  %v631_v39 = vmul.f32 %v2091_v20, %v533_v1  ;;  %v598_v51 = vadd.f32 %v566_v41, %v468_v36  ;;  %v824_v57 = vadd.f32 %v792_v35, %v662_v34  ;;  %v537_v41 = vld [vmem:[%s2063_s28 + $0x68] sm:$0xff] }
  0x77   : > { %v1176_v43 = vmul.f32 %v1144_v38, %v984_v23  ;;  %v1081_v49 = vmul.f32 %v1581_v45, %v1017_v7  ;;  %v1019_v58 = vmax.f32 %v921_v47, 1e-12  ;;  %v890_v59 = vand.u32 2147483647, %v858_v42 }
  0x78   : > { %v469_v55 = vand.u32 2147483647, %v437_v44  ;;  %v985_v50 = vadd.f32 %v953_v31, %v823_v40  ;;  %v502_v56 = vmul.f32 %v2088_v16, %v436_v22  ;;  %v760_v54 = vadd.f32 %v728_v48, %v598_v51  ;;  %v439_v31 = vld [vmem:[%s2055_s22 + $0x68] sm:$0xff] }
  0x79   : > { %1208 = vst [vmem:[%s2131_s13 + $0x30] sm:$0xff] %v1176_v43  ;;  %v1113_v60 = vsub.f32 2.0, %v1081_v49  ;;  %1584 = vrcp.f32 %v1019_v58  ;;  %v632_v62 = vmul.f32 %v2091_v20, %v534_v26  ;;  %v567_v0 = vand.u32 2147483647, %v535_v52 }
  0x7a   : > { %v729_v1 = vand.u32 2147483647, %v2196_v53  ;;  %v663_v8 = vadd.f32 %v631_v39, %v501_v46  ;;  %v793_v9 = vmul.f32 %v2095_v24, %v2171_v3  ;;  %v922_v63 = vadd.f32 %v890_v59, %v760_v54  ;;  %v2226_v39 = vld [vmem:[%s2074_s6 + $0x68] sm:$0xff] }
  0x7b   : > { %v1583_v6 = vpop.eup %1582  ;;  %v1145_v7 = vmul.f32 %v1581_v45, %v1113_v60  ;;  %v986_v4 = vadd.f32 %v954_v29, %v824_v57  ;;  %v599_v12 = vadd.f32 %v567_v0, %v469_v55  ;;  %v891_v13 = vand.u32 2147483647, %v2201_v61  ;;  %v2222_v45 = vld [vmem:[%s2070_s29 + $0x68] sm:$0xff] }
  0x7c   : > { %v1082_v10 = vmul.f32 %v1583_v6, %v1018_v32  ;;  %v955_v18 = vmul.f32 %v2100_v30, %v2176_v2  ;;  %v1020_v19 = vmax.f32 %v922_v63, 1e-12  ;;  %v470_v21 = vand.u32 2147483647, %v438_v5 }
  0x7d   : > { %v1177_v17 = vmul.f32 %v1145_v7, %v985_v50  ;;  %v664_v23 = vadd.f32 %v632_v62, %v502_v56  ;;  %v794_v3 = vmul.f32 %v2095_v24, %v696_v33  ;;  %v761_v11 = vadd.f32 %v729_v1, %v599_v12 }
  0x7e   : > { %v1114_v22 = vsub.f32 2.0, %v1082_v10  ;;  %v825_v26 = vadd.f32 %v793_v9, %v663_v8  ;;  %1586 = vrcp.f32 %v1020_v19  ;;  %v568_v27 = vand.u32 2147483647, %v536_v14 }
  0x7f   : > { %1209 = vst [vmem:[%s2131_s13 + $0x38] sm:$0xff] %v1177_v17  ;;  %v730_v28 = vand.u32 2147483647, %v698_v15  ;;  %v1585_v32 = vpop.eup %1584  ;;  %v956_v2 = vmul.f32 %v2100_v30, %v858_v42  ;;  %v503_v35 = vmul.f32 %v2088_v16, %v437_v44  ;;  %v923_v37 = vadd.f32 %v891_v13, %v761_v11  ;;  %v862_v13 = vld [vmem:[%s2074_s6 + $0x70] sm:$0xff] }
  0x80   : > { %v1146_v34 = vmul.f32 %v1583_v6, %v1114_v22  ;;  %v1083_v33 = vmul.f32 %v1585_v32, %v1019_v58  ;;  %v633_v36 = vmul.f32 %v2091_v20, %v535_v52  ;;  %v600_v38 = vadd.f32 %v568_v27, %v470_v21  ;;  %v440_v58 = vld [vmem:[%s2055_s22 + $0x70] sm:$0xff] }
  0x81   : > { %v892_v40 = vand.u32 2147483647, %v860_v25  ;;  %v826_v46 = vadd.f32 %v794_v3, %v664_v23  ;;  %v1021_v47 = vmax.f32 %v923_v37, 1e-12  ;;  %v471_v48 = vand.u32 2147483647, %v439_v31 }
  0x82   : > { %v1178_v29 = vmul.f32 %v1146_v34, %v986_v4  ;;  %v987_v43 = vadd.f32 %v955_v18, %v825_v26  ;;  %v1115_v42 = vsub.f32 2.0, %v1083_v33  ;;  %v504_v44 = vmul.f32 %v2088_v16, %v438_v5  ;;  %v538_v5 = vld [vmem:[%s2063_s28 + $0x70] sm:$0xff] }
  0x83   : > { %v762_v49 = vadd.f32 %v730_v28, %v600_v38  ;;  %1588 = vrcp.f32 %v1021_v47  ;;  %v634_v51 = vmul.f32 %v2091_v20, %v536_v14  ;;  %v569_v52 = vand.u32 2147483647, %v537_v41  ;;  %v700_v6 = vld [vmem:[%s2070_s29 + $0x70] sm:$0xff]  ;;  %v539_v28 = vld [vmem:[%s2063_s28 + $0x78] sm:$0xff] }
  0x84   : > { %1210 = vst [vmem:[%s2131_s13 + $0x40] sm:$0xff] %v1178_v29  ;;  %v731_v57 = vand.u32 2147483647, %v2222_v45  ;;  %v1587_v59 = vpop.eup %1586  ;;  %v1147_v55 = vmul.f32 %v1585_v32, %v1115_v42  ;;  %v665_v50 = vadd.f32 %v633_v36, %v503_v35  ;;  %v795_v60 = vmul.f32 %v2095_v24, %v2196_v53  ;;  %v2248_v32 = vld [vmem:[%s2070_s29 + $0x78] sm:$0xff] }
  0x85   : > { %v924_v56 = vadd.f32 %v892_v40, %v762_v49  ;;  %v988_v54 = vadd.f32 %v956_v2, %v826_v46  ;;  %v1084_v62 = vmul.f32 %v1587_v59, %v1020_v19  ;;  %v601_v0 = vadd.f32 %v569_v52, %v471_v48  ;;  %v441_v19 = vld [vmem:[%s2055_s22 + $0x78] sm:$0xff]  ;;  %v442_v46 = vld [vmem:[%s2055_s22 + $0x80] sm:$0xff] }
  0x86   : > { %v893_v1 = vand.u32 2147483647, %v2226_v39  ;;  %v1179_v7 = vmul.f32 %v1147_v55, %v987_v43  ;;  %v957_v8 = vmul.f32 %v2100_v30, %v2201_v61  ;;  %v472_v63 = vand.u32 2147483647, %v440_v58  ;;  %v2252_v38 = vld [vmem:[%s2074_s6 + $0x78] sm:$0xff] }
  0x87   : > { %v1022_v9 = vmax.f32 %v924_v56, 1e-12  ;;  %v1116_v4 = vsub.f32 2.0, %v1084_v62  ;;  %v666_v10 = vadd.f32 %v634_v51, %v504_v44  ;;  %v796_v53 = vmul.f32 %v2095_v24, %v698_v15 }
  0x88   : > { %v763_v12 = vadd.f32 %v731_v57, %v601_v0  ;;  %1211 = vst [vmem:[%s2131_s13 + $0x48] sm:$0xff] %v1179_v7  ;;  %v827_v14 = vadd.f32 %v795_v60, %v665_v50  ;;  %v570_v17 = vand.u32 2147483647, %v538_v5  ;;  %v732_v18 = vand.u32 2147483647, %v700_v6 }
  0x89   : > { %1590 = vrcp.f32 %v1022_v9  ;;  %v1589_v21 = vpop.eup %1588  ;;  %v1148_v22 = vmul.f32 %v1587_v59, %v1116_v4  ;;  %v958_v61 = vmul.f32 %v2100_v30, %v860_v25  ;;  %v505_v23 = vmul.f32 %v2088_v16, %v439_v31  ;;  %v702_v59 = vld [vmem:[%s2070_s29 + $0x80] sm:$0xff] }
  0x8a   : > { %v925_v3 = vadd.f32 %v893_v1, %v763_v12  ;;  %v1085_v15 = vmul.f32 %v1589_v21, %v1021_v47  ;;  %v635_v11 = vmul.f32 %v2091_v20, %v537_v41  ;;  %v602_v26 = vadd.f32 %v570_v17, %v472_v63  ;;  %v864_v1 = vld [vmem:[%s2074_s6 + $0x80] sm:$0xff] }
  0x8b   : > { %v894_v27 = vand.u32 2147483647, %v862_v13  ;;  %v1180_v34 = vmul.f32 %v1148_v22, %v988_v54  ;;  %v828_v2 = vadd.f32 %v796_v53, %v666_v10  ;;  %v473_v37 = vand.u32 2147483647, %v441_v19 }
  0x8c   : > { %v1023_v35 = vmax.f32 %v925_v3, 1e-12  ;;  %v989_v33 = vadd.f32 %v957_v8, %v827_v14  ;;  %v1117_v25 = vsub.f32 2.0, %v1085_v15  ;;  %v506_v31 = vmul.f32 %v2088_v16, %v440_v58  ;;  %v540_v58 = vld [vmem:[%s2063_s28 + $0x80] sm:$0xff] }
  0x8d   : > { %v764_v36 = vadd.f32 %v732_v18, %v602_v26  ;;  %1212 = vst [vmem:[%s2131_s13 + $0x50] sm:$0xff] %v1180_v34  ;;  %v636_v40 = vmul.f32 %v2091_v20, %v538_v5  ;;  %v571_v41 = vand.u32 2147483647, %v539_v28  ;;  %v733_v29 = vand.u32 2147483647, %v2248_v32  ;;  %v541_v18 = vld [vmem:[%s2063_s28 + $0x88] sm:$0xff] }
  0x8e   : > { %1592 = vrcp.f32 %v1023_v35  ;;  %v1149_v48 = vmul.f32 %v1589_v21, %v1117_v25  ;;  %v667_v43 = vadd.f32 %v635_v11, %v505_v23  ;;  %v797_v42 = vmul.f32 %v2095_v24, %v2222_v45  ;;  %v2274_v21 = vld [vmem:[%s2070_s29 + $0x88] sm:$0xff] }
  0x8f   : > { %v1591_v47 = vpop.eup %1590  ;;  %v926_v44 = vadd.f32 %v894_v27, %v764_v36  ;;  %v990_v49 = vadd.f32 %v958_v61, %v828_v2  ;;  %v603_v52 = vadd.f32 %v571_v41, %v473_v37  ;;  %v895_v57 = vand.u32 2147483647, %v2252_v38  ;;  %v2278_v26 = vld [vmem:[%s2074_s6 + $0x88] sm:$0xff]  ;;  %v444_v2 = vld [vmem:[%s2055_s22 + $0x90] sm:$0xff] }
  0x90   : > { %v1086_v51 = vmul.f32 %v1591_v47, %v1022_v9  ;;  %v1181_v55 = vmul.f32 %v1149_v48, %v989_v33  ;;  %v959_v50 = vmul.f32 %v2100_v30, %v2226_v39  ;;  %v474_v56 = vand.u32 2147483647, %v442_v46  ;;  %v443_v9 = vld [vmem:[%s2055_s22 + $0x88] sm:$0xff] }
  0x91   : > { %v1024_v60 = vmax.f32 %v926_v44, 1e-12  ;;  %v668_v62 = vadd.f32 %v636_v40, %v506_v31  ;;  %v798_v45 = vmul.f32 %v2095_v24, %v700_v6  ;;  %v765_v0 = vadd.f32 %v733_v29, %v603_v52 }
  0x92   : > { %v1118_v54 = vsub.f32 2.0, %v1086_v51  ;;  %1213 = vst [vmem:[%s2131_s13 + $0x58] sm:$0xff] %v1181_v55  ;;  %v829_v5 = vadd.f32 %v797_v42, %v667_v43  ;;  %v572_v7 = vand.u32 2147483647, %v540_v58  ;;  %v734_v8 = vand.u32 2147483647, %v702_v59 }
  0x93   : > { %1594 = vrcp.f32 %v1024_v60  ;;  %v960_v39 = vmul.f32 %v2100_v30, %v862_v13  ;;  %v507_v10 = vmul.f32 %v2088_v16, %v441_v19  ;;  %v927_v53 = vadd.f32 %v895_v57, %v765_v0  ;;  %v866_v57 = vld [vmem:[%s2074_s6 + $0x90] sm:$0xff] }
  0x94   : > { %v1593_v63 = vpop.eup %1592  ;;  %v1150_v4 = vmul.f32 %v1591_v47, %v1118_v54  ;;  %v637_v12 = vmul.f32 %v2091_v20, %v539_v28  ;;  %v604_v14 = vadd.f32 %v572_v7, %v474_v56  ;;  %v896_v17 = vand.u32 2147483647, %v864_v1  ;;  %v704_v47 = vld [vmem:[%s2070_s29 + $0x90] sm:$0xff] }
  0x95   : > { %v1087_v6 = vmul.f32 %v1593_v63, %v1023_v35  ;;  %v830_v61 = vadd.f32 %v798_v45, %v668_v62  ;;  %v1025_v23 = vmax.f32 %v927_v53, 1e-12  ;;  %v475_v3 = vand.u32 2147483647, %v443_v9 }
  0x96   : > { %v1182_v22 = vmul.f32 %v1150_v4, %v990_v49  ;;  %v991_v15 = vadd.f32 %v959_v50, %v829_v5  ;;  %v508_v19 = vmul.f32 %v2088_v16, %v442_v46  ;;  %v766_v11 = vadd.f32 %v734_v8, %v604_v14  ;;  %v542_v46 = vld [vmem:[%s2063_s28 + $0x90] sm:$0xff]  ;;  %v543_v8 = vld [vmem:[%s2063_s28 + $0x98] sm:$0xff] }
  0x97   : > { %v1119_v13 = vsub.f32 2.0, %v1087_v6  ;;  %1596 = vrcp.f32 %v1025_v23  ;;  %v638_v27 = vmul.f32 %v2091_v20, %v540_v58  ;;  %v573_v28 = vand.u32 2147483647, %v541_v18  ;;  %v2304_v14 = vld [vmem:[%s2074_s6 + $0x98] sm:$0xff] }
  0x98   : > { %1214 = vst [vmem:[%s2131_s13 + $0x60] sm:$0xff] %v1182_v22  ;;  %v735_v34 = vand.u32 2147483647, %v2274_v21  ;;  %v669_v33 = vadd.f32 %v637_v12, %v507_v10  ;;  %v799_v25 = vmul.f32 %v2095_v24, %v2248_v32  ;;  %v928_v31 = vadd.f32 %v896_v17, %v766_v11 }
  0x99   : > { %v1595_v35 = vpop.eup %1594  ;;  %v1151_v37 = vmul.f32 %v1593_v63, %v1119_v13  ;;  %v992_v36 = vadd.f32 %v960_v39, %v830_v61  ;;  %v605_v41 = vadd.f32 %v573_v28, %v475_v3  ;;  %v897_v29 = vand.u32 2147483647, %v2278_v26  ;;  %v2300_v63 = vld [vmem:[%s2070_s29 + $0x98] sm:$0xff]  ;;  %v446_v61 = vld [vmem:[%s2055_s22 + $0xa0] sm:$0xff] }
  0x9a   : > { %v1088_v40 = vmul.f32 %v1595_v35, %v1024_v60  ;;  %v961_v43 = vmul.f32 %v2100_v30, %v2252_v38  ;;  %v1026_v42 = vmax.f32 %v928_v31, 1e-12  ;;  %v476_v44 = vand.u32 2147483647, %v444_v2  ;;  %v445_v60 = vld [vmem:[%s2055_s22 + $0x98] sm:$0xff] }
  0x9b   : > { %v1183_v48 = vmul.f32 %v1151_v37, %v991_v15  ;;  %v670_v51 = vadd.f32 %v638_v27, %v508_v19  ;;  %v800_v32 = vmul.f32 %v2095_v24, %v702_v59  ;;  %v767_v52 = vadd.f32 %v735_v34, %v605_v41 }
  0x9c   : > { %v1120_v49 = vsub.f32 2.0, %v1088_v40  ;;  %v831_v58 = vadd.f32 %v799_v25, %v669_v33  ;;  %1598 = vrcp.f32 %v1026_v42  ;;  %v574_v55 = vand.u32 2147483647, %v542_v46 }
  0x9d   : > { %1215 = vst [vmem:[%s2131_s13 + $0x68] sm:$0xff] %v1183_v48  ;;  %v736_v50 = vand.u32 2147483647, %v704_v47  ;;  %v1597_v56 = vpop.eup %1596  ;;  %v962_v38 = vmul.f32 %v2100_v30, %v864_v1  ;;  %v509_v62 = vmul.f32 %v2088_v16, %v443_v9  ;;  %v929_v45 = vadd.f32 %v897_v29, %v767_v52  ;;  %v868_v29 = vld [vmem:[%s2074_s6 + $0xa0] sm:$0xff] }
  0x9e   : > { %v1152_v54 = vmul.f32 %v1595_v35, %v1120_v49  ;;  %v1089_v59 = vmul.f32 %v1597_v56, %v1025_v23  ;;  %v639_v0 = vmul.f32 %v2091_v20, %v541_v18  ;;  %v606_v5 = vadd.f32 %v574_v55, %v476_v44  ;;  %v706_v35 = vld [vmem:[%s2070_s29 + $0xa0] sm:$0xff] }
  0x9f   : > { %v898_v7 = vand.u32 2147483647, %v866_v57  ;;  %v832_v39 = vadd.f32 %v800_v32, %v670_v51  ;;  %v1027_v10 = vmax.f32 %v929_v45, 1e-12  ;;  %v477_v53 = vand.u32 2147483647, %v445_v60 }
  0xa0   : > { %v1184_v4 = vmul.f32 %v1152_v54, %v992_v36  ;;  %v993_v6 = vadd.f32 %v961_v43, %v831_v58  ;;  %v1121_v1 = vsub.f32 2.0, %v1089_v59  ;;  %v510_v9 = vmul.f32 %v2088_v16, %v444_v2  ;;  %v544_v2 = vld [vmem:[%s2063_s28 + $0xa0] sm:$0xff] }
  0xa1   : > { %v768_v12 = vadd.f32 %v736_v50, %v606_v5  ;;  %1600 = vrcp.f32 %v1027_v10  ;;  %v640_v17 = vmul.f32 %v2091_v20, %v542_v46  ;;  %v575_v18 = vand.u32 2147483647, %v543_v8  ;;  %v545_v50 = vld [vmem:[%s2063_s28 + $0xa8] sm:$0xff] }
  0xa2   : > { %1216 = vst [vmem:[%s2131_s13 + $0x70] sm:$0xff] %v1184_v4  ;;  %v737_v22 = vand.u32 2147483647, %v2300_v63  ;;  %v1599_v23 = vpop.eup %1598  ;;  %v1153_v3 = vmul.f32 %v1597_v56, %v1121_v1  ;;  %v671_v15 = vadd.f32 %v639_v0, %v509_v62  ;;  %v801_v13 = vmul.f32 %v2095_v24, %v2274_v21  ;;  %v2326_v56 = vld [vmem:[%s2070_s29 + $0xa8] sm:$0xff] }
  0xa3   : > { %v930_v19 = vadd.f32 %v898_v7, %v768_v12  ;;  %v994_v11 = vadd.f32 %v962_v38, %v832_v39  ;;  %v1090_v27 = vmul.f32 %v1599_v23, %v1026_v42  ;;  %v607_v28 = vadd.f32 %v575_v18, %v477_v53  ;;  %v447_v42 = vld [vmem:[%s2055_s22 + $0xa8] sm:$0xff]  ;;  %v448_v39 = vld [vmem:[%s2055_s22 + $0xb0] sm:$0xff] }
  0xa4   : > { %v899_v34 = vand.u32 2147483647, %v2304_v14  ;;  %v1185_v37 = vmul.f32 %v1153_v3, %v993_v6  ;;  %v963_v33 = vmul.f32 %v2100_v30, %v2278_v26  ;;  %v478_v31 = vand.u32 2147483647, %v446_v61  ;;  %v2330_v5 = vld [vmem:[%s2074_s6 + $0xa8] sm:$0xff] }
  0xa5   : > { %v1028_v25 = vmax.f32 %v930_v19, 1e-12  ;;  %v1122_v36 = vsub.f32 2.0, %v1090_v27  ;;  %v672_v40 = vadd.f32 %v640_v17, %v510_v9  ;;  %v802_v21 = vmul.f32 %v2095_v24, %v704_v47 }
  0xa6   : > { %v769_v41 = vadd.f32 %v737_v22, %v607_v28  ;;  %1217 = vst [vmem:[%s2131_s13 + $0x78] sm:$0xff] %v1185_v37  ;;  %v833_v46 = vadd.f32 %v801_v13, %v671_v15  ;;  %v576_v48 = vand.u32 2147483647, %v544_v2  ;;  %v738_v43 = vand.u32 2147483647, %v706_v35 }
  0xa7   : > { %1602 = vrcp.f32 %v1028_v25  ;;  %v1601_v44 = vpop.eup %1600  ;;  %v1154_v49 = vmul.f32 %v1599_v23, %v1122_v36  ;;  %v964_v26 = vmul.f32 %v2100_v30, %v866_v57  ;;  %v511_v51 = vmul.f32 %v2088_v16, %v445_v60  ;;  %v708_v23 = vld [vmem:[%s2070_s29 + $0xb0] sm:$0xff] }
  0xa8   : > { %v931_v32 = vadd.f32 %v899_v34, %v769_v41  ;;  %v1091_v47 = vmul.f32 %v1601_v44, %v1027_v10  ;;  %v641_v52 = vmul.f32 %v2091_v20, %v543_v8  ;;  %v608_v58 = vadd.f32 %v576_v48, %v478_v31  ;;  %v870_v34 = vld [vmem:[%s2074_s6 + $0xb0] sm:$0xff] }
  0xa9   : > { %v900_v55 = vand.u32 2147483647, %v868_v29  ;;  %v1186_v54 = vmul.f32 %v1154_v49, %v994_v11  ;;  %v834_v38 = vadd.f32 %v802_v21, %v672_v40  ;;  %v479_v45 = vand.u32 2147483647, %v447_v42 }
  0xaa   : > { %v1029_v62 = vmax.f32 %v931_v32, 1e-12  ;;  %v995_v59 = vadd.f32 %v963_v33, %v833_v46  ;;  %v1123_v57 = vsub.f32 2.0, %v1091_v47  ;;  %v512_v60 = vmul.f32 %v2088_v16, %v446_v61  ;;  %v546_v61 = vld [vmem:[%s2063_s28 + $0xb0] sm:$0xff] }
  0xab   : > { %v770_v0 = vadd.f32 %v738_v43, %v608_v58  ;;  %1218 = vst [vmem:[%s2131_s13 + $0x80] sm:$0xff] %v1186_v54  ;;  %v642_v7 = vmul.f32 %v2091_v20, %v544_v2  ;;  %v577_v8 = vand.u32 2147483647, %v545_v50  ;;  %v739_v4 = vand.u32 2147483647, %v2326_v56  ;;  %v547_v43 = vld [vmem:[%s2063_s28 + $0xb8] sm:$0xff] }
  0xac   : > { %1604 = vrcp.f32 %v1029_v62  ;;  %v1155_v53 = vmul.f32 %v1601_v44, %v1123_v57  ;;  %v673_v6 = vadd.f32 %v641_v52, %v511_v51  ;;  %v803_v1 = vmul.f32 %v2095_v24, %v2300_v63  ;;  %v2352_v44 = vld [vmem:[%s2070_s29 + $0xb8] sm:$0xff] }
  0xad   : > { %v1603_v10 = vpop.eup %1602  ;;  %v932_v9 = vadd.f32 %v900_v55, %v770_v0  ;;  %v996_v12 = vadd.f32 %v964_v26, %v834_v38  ;;  %v609_v18 = vadd.f32 %v577_v8, %v479_v45  ;;  %v901_v22 = vand.u32 2147483647, %v2330_v5  ;;  %v2356_v58 = vld [vmem:[%s2074_s6 + $0xb8] sm:$0xff]  ;;  %v450_v38 = vld [vmem:[%s2055_s22 + $0xc0] sm:$0xff] }
  0xae   : > { %v1092_v17 = vmul.f32 %v1603_v10, %v1028_v25  ;;  %v1187_v3 = vmul.f32 %v1155_v53, %v995_v59  ;;  %v965_v15 = vmul.f32 %v2100_v30, %v2304_v14  ;;  %v480_v19 = vand.u32 2147483647, %v448_v39  ;;  %v449_v25 = vld [vmem:[%s2055_s22 + $0xb8] sm:$0xff] }
  0xaf   : > { %v1030_v13 = vmax.f32 %v932_v9, 1e-12  ;;  %v674_v27 = vadd.f32 %v642_v7, %v512_v60  ;;  %v804_v63 = vmul.f32 %v2095_v24, %v706_v35  ;;  %v771_v28 = vadd.f32 %v739_v4, %v609_v18 }
  0xb0   : > { %v1124_v11 = vsub.f32 2.0, %v1092_v17  ;;  %1219 = vst [vmem:[%s2131_s13 + $0x88] sm:$0xff] %v1187_v3  ;;  %v835_v2 = vadd.f32 %v803_v1, %v673_v6  ;;  %v578_v37 = vand.u32 2147483647, %v546_v61  ;;  %v740_v33 = vand.u32 2147483647, %v708_v23 }
  0xb1   : > { %1606 = vrcp.f32 %v1030_v13  ;;  %v966_v14 = vmul.f32 %v2100_v30, %v868_v29  ;;  %v513_v40 = vmul.f32 %v2088_v16, %v447_v42  ;;  %v933_v21 = vadd.f32 %v901_v22, %v771_v28  ;;  %v872_v22 = vld [vmem:[%s2074_s6 + $0xc0] sm:$0xff] }
  0xb2   : > { %v1605_v31 = vpop.eup %1604  ;;  %v1156_v36 = vmul.f32 %v1603_v10, %v1124_v11  ;;  %v643_v41 = vmul.f32 %v2091_v20, %v545_v50  ;;  %v610_v46 = vadd.f32 %v578_v37, %v480_v19  ;;  %v902_v48 = vand.u32 2147483647, %v870_v34  ;;  %v710_v10 = vld [vmem:[%s2070_s29 + $0xc0] sm:$0xff] }
  0xb3   : > { %v1093_v35 = vmul.f32 %v1605_v31, %v1029_v62  ;;  %v836_v26 = vadd.f32 %v804_v63, %v674_v27  ;;  %v1031_v51 = vmax.f32 %v933_v21, 1e-12  ;;  %v481_v32 = vand.u32 2147483647, %v449_v25 }
  0xb4   : > { %v1188_v49 = vmul.f32 %v1156_v36, %v996_v12  ;;  %v997_v47 = vadd.f32 %v965_v15, %v835_v2  ;;  %v514_v42 = vmul.f32 %v2088_v16, %v448_v39  ;;  %v772_v52 = vadd.f32 %v740_v33, %v610_v46  ;;  %v548_v39 = vld [vmem:[%s2063_s28 + $0xc0] sm:$0xff]  ;;  %v549_v33 = vld [vmem:[%s2063_s28 + $0xc8] sm:$0xff] }
  0xb5   : > { %v1125_v29 = vsub.f32 2.0, %v1093_v35  ;;  %1608 = vrcp.f32 %v1031_v51  ;;  %v644_v55 = vmul.f32 %v2091_v20, %v546_v61  ;;  %v579_v50 = vand.u32 2147483647, %v547_v43  ;;  %v2382_v46 = vld [vmem:[%s2074_s6 + $0xc8] sm:$0xff] }
  0xb6   : > { %1220 = vst [vmem:[%s2131_s13 + $0x90] sm:$0xff] %v1188_v49  ;;  %v741_v54 = vand.u32 2147483647, %v2352_v44  ;;  %v675_v59 = vadd.f32 %v643_v41, %v513_v40  ;;  %v805_v57 = vmul.f32 %v2095_v24, %v2326_v56  ;;  %v934_v60 = vadd.f32 %v902_v48, %v772_v52 }
  0xb7   : > { %v1607_v62 = vpop.eup %1606  ;;  %v1157_v45 = vmul.f32 %v1605_v31, %v1125_v29  ;;  %v998_v0 = vadd.f32 %v966_v14, %v836_v26  ;;  %v611_v8 = vadd.f32 %v579_v50, %v481_v32  ;;  %v903_v4 = vand.u32 2147483647, %v2356_v58  ;;  %v2378_v31 = vld [vmem:[%s2070_s29 + $0xc8] sm:$0xff]  ;;  %v452_v26 = vld [vmem:[%s2055_s22 + $0xd0] sm:$0xff] }
  0xb8   : > { %v1094_v7 = vmul.f32 %v1607_v62, %v1030_v13  ;;  %v967_v6 = vmul.f32 %v2100_v30, %v2330_v5  ;;  %v1032_v1 = vmax.f32 %v934_v60, 1e-12  ;;  %v482_v9 = vand.u32 2147483647, %v450_v38  ;;  %v451_v13 = vld [vmem:[%s2055_s22 + $0xc8] sm:$0xff] }
  0xb9   : > { %v1189_v53 = vmul.f32 %v1157_v45, %v997_v47  ;;  %v676_v17 = vadd.f32 %v644_v55, %v514_v42  ;;  %v806_v56 = vmul.f32 %v2095_v24, %v708_v23  ;;  %v773_v18 = vadd.f32 %v741_v54, %v611_v8 }
  0xba   : > { %v1126_v12 = vsub.f32 2.0, %v1094_v7  ;;  %v837_v61 = vadd.f32 %v805_v57, %v675_v59  ;;  %1610 = vrcp.f32 %v1032_v1  ;;  %v580_v3 = vand.u32 2147483647, %v548_v39 }
  0xbb   : > { %1221 = vst [vmem:[%s2131_s13 + $0x98] sm:$0xff] %v1189_v53  ;;  %v742_v15 = vand.u32 2147483647, %v710_v10  ;;  %v1609_v19 = vpop.eup %1608  ;;  %v968_v5 = vmul.f32 %v2100_v30, %v870_v34  ;;  %v515_v27 = vmul.f32 %v2088_v16, %v449_v25  ;;  %v935_v63 = vadd.f32 %v903_v4, %v773_v18  ;;  %v2397_v4 = vld [vmem:[%s2074_s6 + $0xd0] sm:$0xff] }
  0xbc   : > { %v1158_v11 = vmul.f32 %v1607_v62, %v1126_v12  ;;  %v1095_v23 = vmul.f32 %v1609_v19, %v1031_v51  ;;  %v645_v28 = vmul.f32 %v2091_v20, %v547_v43  ;;  %v612_v2 = vadd.f32 %v580_v3, %v482_v9  ;;  %v712_v62 = vld [vmem:[%s2070_s29 + $0xd0] sm:$0xff] }
  0xbd   : > { %v904_v37 = vand.u32 2147483647, %v872_v22  ;;  %v838_v14 = vadd.f32 %v806_v56, %v676_v17  ;;  %v1033_v40 = vmax.f32 %v935_v63, 1e-12  ;;  %v483_v21 = vand.u32 2147483647, %v451_v13 }
  0xbe   : > { %v1190_v36 = vmul.f32 %v1158_v11, %v998_v0  ;;  %v999_v35 = vadd.f32 %v967_v6, %v837_v61  ;;  %v1127_v34 = vsub.f32 2.0, %v1095_v23  ;;  %v516_v25 = vmul.f32 %v2088_v16, %v450_v38  ;;  %v550_v38 = vld [vmem:[%s2063_s28 + $0xd0] sm:$0xff] }
  0xbf   : > { %v774_v41 = vadd.f32 %v742_v15, %v612_v2  ;;  %1612 = vrcp.f32 %v1033_v40  ;;  %v646_v48 = vmul.f32 %v2091_v20, %v548_v39  ;;  %v581_v43 = vand.u32 2147483647, %v549_v33  ;;  %v551_v15 = vld [vmem:[%s2063_s28 + $0xd8] sm:$0xff] }
  0xc0   : > { %1222 = vst [vmem:[%s2131_s13 + $0xa0] sm:$0xff] %v1190_v36  ;;  %v743_v49 = vand.u32 2147483647, %v2378_v31  ;;  %v1611_v51 = vpop.eup %1610  ;;  %v1159_v32 = vmul.f32 %v1609_v19, %v1127_v34  ;;  %v677_v47 = vadd.f32 %v645_v28, %v515_v27  ;;  %v807_v29 = vmul.f32 %v2095_v24, %v2352_v44  ;;  %v713_v19 = vld [vmem:[%s2070_s29 + $0xd8] sm:$0xff] }
  0xc1   : > { %v936_v42 = vadd.f32 %v904_v37, %v774_v41  ;;  %v1000_v52 = vadd.f32 %v968_v5, %v838_v14  ;;  %v1096_v55 = vmul.f32 %v1611_v51, %v1032_v1  ;;  %v613_v50 = vadd.f32 %v581_v43, %v483_v21  ;;  %v453_v1 = vld [vmem:[%s2055_s22 + $0xd8] sm:$0xff]  ;;  %v454_v14 = vld [vmem:[%s2055_s22 + $0xe0] sm:$0xff] }
  0xc2   : > { %v905_v54 = vand.u32 2147483647, %v2382_v46  ;;  %v1191_v45 = vmul.f32 %v1159_v32, %v999_v35  ;;  %v969_v59 = vmul.f32 %v2100_v30, %v2356_v58  ;;  %v484_v60 = vand.u32 2147483647, %v452_v26  ;;  %v2409_v2 = vld [vmem:[%s2074_s6 + $0xd8] sm:$0xff] }
  0xc3   : > { %v1034_v57 = vmax.f32 %v936_v42, 1e-12  ;;  %v1128_v0 = vsub.f32 2.0, %v1096_v55  ;;  %v678_v7 = vadd.f32 %v646_v48, %v516_v25  ;;  %v808_v44 = vmul.f32 %v2095_v24, %v710_v10 }
  0xc4   : > { %v775_v8 = vadd.f32 %v743_v49, %v613_v50  ;;  %1223 = vst [vmem:[%s2131_s13 + $0xa8] sm:$0xff] %v1191_v45  ;;  %v839_v39 = vadd.f32 %v807_v29, %v677_v47  ;;  %v582_v53 = vand.u32 2147483647, %v550_v38  ;;  %v744_v6 = vand.u32 2147483647, %v712_v62 }
  0xc5   : > { %1614 = vrcp.f32 %v1034_v57  ;;  %v1613_v9 = vpop.eup %1612  ;;  %v1160_v12 = vmul.f32 %v1611_v51, %v1128_v0  ;;  %v970_v58 = vmul.f32 %v2100_v30, %v872_v22  ;;  %v517_v17 = vmul.f32 %v2088_v16, %v451_v13  ;;  %v714_v51 = vld [vmem:[%s2070_s29 + $0xe0] sm:$0xff] }
  0xc6   : > { %v937_v56 = vadd.f32 %v905_v54, %v775_v8  ;;  %v1097_v10 = vmul.f32 %v1613_v9, %v1033_v40  ;;  %v647_v18 = vmul.f32 %v2091_v20, %v549_v33  ;;  %v614_v61 = vadd.f32 %v582_v53, %v484_v60  ;;  %v2423_v54 = vld [vmem:[%s2074_s6 + $0xe0] sm:$0xff] }
  0xc7   : > { %v906_v3 = vand.u32 2147483647, %v2397_v4  ;;  %v1192_v11 = vmul.f32 %v1160_v12, %v1000_v52  ;;  %v840_v5 = vadd.f32 %v808_v44, %v678_v7  ;;  %v485_v63 = vand.u32 2147483647, %v453_v1 }
  0xc8   : > { %v1035_v27 = vmax.f32 %v937_v56, 1e-12  ;;  %v1001_v23 = vadd.f32 %v969_v59, %v839_v39  ;;  %v1129_v22 = vsub.f32 2.0, %v1097_v10  ;;  %v518_v13 = vmul.f32 %v2088_v16, %v452_v26  ;;  %v552_v26 = vld [vmem:[%s2063_s28 + $0xe0] sm:$0xff] }
  0xc9   : > { %v776_v28 = vadd.f32 %v744_v6, %v614_v61  ;;  %1224 = vst [vmem:[%s2131_s13 + $0xb0] sm:$0xff] %v1192_v11  ;;  %v648_v37 = vmul.f32 %v2091_v20, %v550_v38  ;;  %v583_v33 = vand.u32 2147483647, %v551_v15  ;;  %v745_v36 = vand.u32 2147483647, %v713_v19  ;;  %v553_v6 = vld [vmem:[%s2063_s28 + $0xe8] sm:$0xff] }
  0xca   : > { %1616 = vrcp.f32 %v1035_v27  ;;  %v1161_v21 = vmul.f32 %v1613_v9, %v1129_v22  ;;  %v679_v35 = vadd.f32 %v647_v18, %v517_v17  ;;  %v809_v34 = vmul.f32 %v2095_v24, %v2378_v31  ;;  %v715_v9 = vld [vmem:[%s2070_s29 + $0xe8] sm:$0xff] }
  0xcb   : > { %v1615_v40 = vpop.eup %1614  ;;  %v938_v25 = vadd.f32 %v906_v3, %v776_v28  ;;  %v1002_v41 = vadd.f32 %v970_v58, %v840_v5  ;;  %v615_v43 = vadd.f32 %v583_v33, %v485_v63  ;;  %v907_v49 = vand.u32 2147483647, %v2409_v2  ;;  %v2436_v3 = vld [vmem:[%s2074_s6 + $0xe8] sm:$0xff]  ;;  %v456_v5 = vld [vmem:[%s2055_s22 + $0xf0] sm:$0xff] }
  0xcc   : > { %v1098_v48 = vmul.f32 %v1615_v40, %v1034_v57  ;;  %v1193_v32 = vmul.f32 %v1161_v21, %v1001_v23  ;;  %v971_v47 = vmul.f32 %v2100_v30, %v2382_v46  ;;  %v486_v42 = vand.u32 2147483647, %v454_v14  ;;  %v455_v57 = vld [vmem:[%s2055_s22 + $0xe8] sm:$0xff] }
  0xcd   : > { %v1036_v29 = vmax.f32 %v938_v25, 1e-12  ;;  %v680_v55 = vadd.f32 %v648_v37, %v518_v13  ;;  %v810_v31 = vmul.f32 %v2095_v24, %v712_v62  ;;  %v777_v50 = vadd.f32 %v745_v36, %v615_v43  ;;  %v554_v36 = vld [vmem:[%s2063_s28 + $0xf0] sm:$0xff] }
  0xce   : > { %v1130_v52 = vsub.f32 2.0, %v1098_v48  ;;  %1225 = vst [vmem:[%s2131_s13 + $0xb8] sm:$0xff] %v1193_v32  ;;  %v841_v38 = vadd.f32 %v809_v34, %v679_v35  ;;  %v584_v45 = vand.u32 2147483647, %v552_v26  ;;  %v746_v59 = vand.u32 2147483647, %v714_v51 }
  0xcf   : > { %1618 = vrcp.f32 %v1036_v29  ;;  %v519_v46 = vmul.f32 %v2088_v16, %v453_v1  ;;  %v649_v7 = vmul.f32 %v2091_v20, %v551_v15  ;;  %v939_v44 = vadd.f32 %v907_v49, %v777_v50  ;;  %v2449_v49 = vld [vmem:[%s2074_s6 + $0xf0] sm:$0xff] }
  0xd0   : > { %v1617_v60 = vpop.eup %1616  ;;  %v1162_v0 = vmul.f32 %v1615_v40, %v1130_v52  ;;  %v972_v8 = vmul.f32 %v2100_v30, %v2397_v4  ;;  %v616_v39 = vadd.f32 %v584_v45, %v486_v42  ;;  %v908_v53 = vand.u32 2147483647, %v2423_v54  ;;  %v716_v40 = vld [vmem:[%s2070_s29 + $0xf0] sm:$0xff]  ;;  %v555_v45 = vld [vmem:[%s2063_s28 + $0xf8] sm:$0xff] }
  0xd1   : > { %v1099_v62 = vmul.f32 %v1617_v60, %v1035_v27  ;;  %v842_v58 = vadd.f32 %v810_v31, %v680_v55  ;;  %v1037_v17 = vmax.f32 %v939_v44, 1e-12  ;;  %v487_v56 = vand.u32 2147483647, %v455_v57 }
  0xd2   : > { %v1194_v12 = vmul.f32 %v1162_v0, %v1002_v41  ;;  %v1003_v1 = vadd.f32 %v971_v47, %v841_v38  ;;  %v811_v18 = vmul.f32 %v2095_v24, %v713_v19  ;;  %v778_v61 = vadd.f32 %v746_v59, %v616_v39  ;;  %v717_v59 = vld [vmem:[%s2070_s29 + $0xf8] sm:$0xff] }
  0xd3   : > { %v1131_v10 = vsub.f32 2.0, %v1099_v62  ;;  %v681_v4 = vadd.f32 %v649_v7, %v519_v46  ;;  %1620 = vrcp.f32 %v1037_v17  ;;  %v585_v15 = vand.u32 2147483647, %v553_v6  ;;  %v879_v39 = vld [vmem:[%s2074_s6 + $0xf8] sm:$0xff] }
  0xd4   : > { %1226 = vst [vmem:[%s2131_s13 + $0xc0] sm:$0xff] %v1194_v12  ;;  %v747_v11 = vand.u32 2147483647, %v715_v9  ;;  %v520_v23 = vmul.f32 %v2088_v16, %v454_v14  ;;  %v650_v22 = vmul.f32 %v2091_v20, %v552_v26  ;;  %v940_v13 = vadd.f32 %v908_v53, %v778_v61 }
  0xd5   : > { %v1619_v27 = vpop.eup %1618  ;;  %v1163_v63 = vmul.f32 %v1617_v60, %v1131_v10  ;;  %v1004_v19 = vadd.f32 %v972_v8, %v842_v58  ;;  %v617_v37 = vadd.f32 %v585_v15, %v487_v56  ;;  %v909_v33 = vand.u32 2147483647, %v2436_v3 }
  0xd6   : > { %v1100_v28 = vmul.f32 %v1619_v27, %v1036_v29  ;;  %v973_v35 = vmul.f32 %v2100_v30, %v2409_v2  ;;  %v1038_v34 = vmax.f32 %v940_v13, 1e-12  ;;  %v488_v25 = vand.u32 2147483647, %v456_v5  ;;  %v457_v29 = vld [vmem:[%s2055_s22 + $0xf8] sm:$0xff]  ;;  %s1785_s22 = scalar_lea.hbm %s2523_s5, 512 }
  0xd7   : > { %v1195_v21 = vmul.f32 %v1163_v63, %v1003_v1  ;;  %v843_v41 = vadd.f32 %v811_v18, %v681_v4  ;;  %v812_v48 = vmul.f32 %v2095_v24, %v714_v51  ;;  %v779_v43 = vadd.f32 %v747_v11, %v617_v37  ;;  %p1787_p11 = scmp.lt.s32.totalorder %s1785_s22, %s1781_s9 }
  0xd8   : > { %v1132_v14 = vsub.f32 2.0, %v1100_v28  ;;  %v682_v26 = vadd.f32 %v650_v22, %v520_v23  ;;  %1622 = vrcp.f32 %v1038_v34  ;;  %v586_v32 = vand.u32 2147483647, %v554_v36 }
  0xd9   : > { %1227 = vst [vmem:[%s2131_s13 + $0xc8] sm:$0xff] %v1195_v21  ;;  %v748_v47 = vand.u32 2147483647, %v716_v40  ;;  %v1621_v42 = vpop.eup %1620  ;;  %v521_v2 = vmul.f32 %v2088_v16, %v455_v57  ;;  %v941_v55 = vadd.f32 %v909_v33, %v779_v43  ;;  %v651_v51 = vmul.f32 %v2091_v20, %v553_v6  ;;  %p1788_p12 = por %p1787_p11, %p1786_p10 }
  0xda   : > { %v1164_v52 = vmul.f32 %v1619_v27, %v1132_v14  ;;  %v1101_v31 = vmul.f32 %v1621_v42, %v1037_v17  ;;  %v618_v50 = vadd.f32 %v586_v32, %v488_v25  ;;  %v910_v38 = vand.u32 2147483647, %v2449_v49 }
  0xdb   : > { %v1005_v0 = vadd.f32 %v973_v35, %v843_v41  ;;  %v1039_v46 = vmax.f32 %v941_v55, 1e-12  ;;  %v489_v7 = vand.u32 2147483647, %v457_v29  ;;  %v844_v62 = vadd.f32 %v812_v48, %v682_v26  ;;  %p1789_p13 = pnand %p1788_p12, %p1784_p9 }
  0xdc   : > { %v1196_v60 = vmul.f32 %v1164_v52, %v1004_v19  ;;  %v1133_v44 = vsub.f32 2.0, %v1101_v31  ;;  %v974_v57 = vmul.f32 %v2100_v30, %v2423_v54  ;;  %v780_v8 = vadd.f32 %v748_v47, %v618_v50 }
  0xdd   : > { %v813_v53 = vmul.f32 %v2095_v24, %v715_v9  ;;  %1624 = vrcp.f32 %v1039_v46  ;;  %v587_v6 = vand.u32 2147483647, %v555_v45  ;;  %v749_v12 = vand.u32 2147483647, %v717_v59 }
  0xde   : > { %1228 = vst [vmem:[%s2131_s13 + $0xd0] sm:$0xff] %v1196_v60  ;;  %v1623_v58 = vpop.eup %1622  ;;  %v1165_v17 = vmul.f32 %v1621_v42, %v1133_v44  ;;  %v683_v56 = vadd.f32 %v651_v51, %v521_v2  ;;  %v522_v1 = vmul.f32 %v2088_v16, %v456_v5  ;;  %v942_v10 = vadd.f32 %v910_v38, %v780_v8 }
  0xdf   : > { %v1102_v18 = vmul.f32 %v1623_v58, %v1038_v34  ;;  %v652_v61 = vmul.f32 %v2091_v20, %v554_v36  ;;  %v619_v4 = vadd.f32 %v587_v6, %v489_v7  ;;  %v911_v54 = vand.u32 2147483647, %v879_v39 }
  0xe0   : > { %v1197_v15 = vmul.f32 %v1165_v17, %v1005_v0  ;;  %v1040_v11 = vmax.f32 %v942_v10, 1e-12  ;;  %v1006_v27 = vadd.f32 %v974_v57, %v844_v62  ;;  %v845_v23 = vadd.f32 %v813_v53, %v683_v56 }
  0xe1   : > { %v1134_v63 = vsub.f32 2.0, %v1102_v18  ;;  %v781_v9 = vadd.f32 %v749_v12, %v619_v4  ;;  %v975_v22 = vmul.f32 %v2100_v30, %v2436_v3  ;;  %v684_v19 = vadd.f32 %v652_v61, %v522_v1 }
  0xe2   : > { %1229 = vst [vmem:[%s2131_s13 + $0xd8] sm:$0xff] %v1197_v15  ;;  %1626 = vrcp.f32 %v1040_v11  ;;  %v814_v28 = vmul.f32 %v2095_v24, %v716_v40  ;;  %v523_v36 = vmul.f32 %v2088_v16, %v457_v29  ;;  %v653_v21 = vmul.f32 %v2091_v20, %v555_v45 }
  0xe3   : > { %v1625_v13 = vpop.eup %1624  ;;  %v1166_v5 = vmul.f32 %v1623_v58, %v1134_v63  ;;  %v943_v37 = vadd.f32 %v911_v54, %v781_v9  ;;  %v1007_v25 = vadd.f32 %v975_v22, %v845_v23  ;;  %v976_v41 = vmul.f32 %v2100_v30, %v2449_v49 }
  0xe4   : > { %v1103_v33 = vmul.f32 %v1625_v13, %v1039_v46  ;;  %v846_v3 = vadd.f32 %v814_v28, %v684_v19  ;;  %v685_v43 = vadd.f32 %v653_v21, %v523_v36  ;;  %v815_v26 = vmul.f32 %v2095_v24, %v717_v59 }
  0xe5   : > { %v1198_v35 = vmul.f32 %v1166_v5, %v1006_v27  ;;  %v1041_v34 = vmax.f32 %v943_v37, 1e-12  ;;  %v977_v42 = vmul.f32 %v2100_v30, %v879_v39 }
  0xe6   : > { %v1135_v14 = vsub.f32 2.0, %v1103_v33  ;;  %v1008_v20 = vadd.f32 %v976_v41, %v846_v3  ;;  %v847_v29 = vadd.f32 %v815_v26, %v685_v43 }
  0xe7   : > { %1230 = vst [vmem:[%s2131_s13 + $0xe0] sm:$0xff] %v1198_v35  ;;  %1628 = vrcp.f32 %v1041_v34 }
  0xe8   : > { %v1627_v48 = vpop.eup %1626  ;;  %v1167_v40 = vmul.f32 %v1625_v13, %v1135_v14  ;;  %v1009_v55 = vadd.f32 %v977_v42, %v847_v29 }
  0xe9   : > { %v1104_v16 = vmul.f32 %v1627_v48, %v1040_v11 }
  0xea   : > { %v1199_v32 = vmul.f32 %v1167_v40, %v1007_v25 }
  0xeb   : > { %v1136_v47 = vsub.f32 2.0, %v1104_v16 }
  0xec   : > { %1231 = vst [vmem:[%s2131_s13 + $0xe8] sm:$0xff] %v1199_v32 }
  0xed   : > { %v1629_v49 = vpop.eup %1628  ;;  %v1168_v52 = vmul.f32 %v1627_v48, %v1136_v47 }
  0xee   : > { %v1105_v24 = vmul.f32 %v1629_v49, %v1041_v34 }
  0xef   : > { %v1200_v2 = vmul.f32 %v1168_v52, %v1008_v20 }
  0xf0   : > { %v1137_v31 = vsub.f32 2.0, %v1105_v24 }
  0xf1   : > { %1232 = vst [vmem:[%s2131_s13 + $0xf0] sm:$0xff] %v1200_v2 }
  0xf2   : > { %v1169_v51 = vmul.f32 %v1629_v49, %v1137_v31 }
  0xf4   : > { %v1201_v50 = vmul.f32 %v1169_v51, %v1009_v55 }
  0xf6   : > { %1233 = vst [vmem:[%s2131_s13 + $0xf8] sm:$0xff] %v1201_v50 }
  0xf7   : > { %1792 = shalt.err (!%p1789_p13)
}
  0xf8   : > { %s1864_s1 = smov 256   ;;  %s1865_s28 = smov 16  }
  0xf9   : > { %1486 = dma.vmem_to_hbm [thread:$0]  (%p1988_p0), %s1251_s21, 4096, %s1253_s10, %s1235_s0, %s1864_s1, %s1864_s1, %s1865_s28  }
  0xfa PF: > { %s2551_s29 = sld [smem:[#allocation20_spill]]  ;;  %s1267_s30 = sand.u32 1, %s1839_s18  }
  0xfb   : > { %p1506_p4 = pnand %p1431_p3, %p1992_p2  ;;  %s1268_s6 = scalar_lea.sflag [#allocation4], %s1267_s30 }
  0xfd   : > { %p1507_p5 = pneg %p1506_p4 }
  0xff   : > { %1834 = dma.done.wait (%p1507_p5), %s1268_s6, 4096  }
 0x100   : > { %1836 = vsyncadd (%p1507_p5), %s1268_s6, 4294963200  ;;  %s28_s23 = sadd.s32 1, %s2551_s29   ;;  %s2552_s14 = sld [smem:[#allocation18_spill]] }
 0x101   : > { %p25_p1 = scmp.ge.s32.totalorder %s28_s23, 4   ;;  %s2553_s20 = sld [smem:[#allocation22_spill]] }
 0x102   : > { %s2554_s21 = sld [smem:[#allocation19_spill]]  ;;  %s2556_s18 = smov %s1843_s19 }
 0x103   : > { %s2555_s22 = sld [smem:[#allocation21_spill]]  ;;  %27 = sbr.rel (!%p25_p1) target bundleno = 15 (0xf), region = 127 }
 0x106   : > { %s2557_s19 = smov %s2552_s14 }
 0x108   :  { %1274 = vsyncpa [#allocation3], 1 }
 0x109   :  { %1276 = vsyncpa [#allocation3 + $0x1], 1 }
 0x10a   :  { %1277 = vsyncpa [#allocation8], 1 }
 0x10b   :  { %1279 = vsyncpa [#allocation8 + $0x1], 1 }
 0x10c   :  { %1280 = vsyncpa [#allocation11], 1 }
 0x10d   :  { %1282 = vsyncpa [#allocation11 + $0x1], 1 }
 0x10e   :  { %1283 = vsyncpa [#allocation4], 1 }
 0x10f   :  { %1285 = vsyncpa [#allocation4 + $0x1], 1 }
 0x110   :  { %1286 = vsyncpa [#allocation5], 1 }
 0x111   :  { %1288 = vsyncpa [#allocation5 + $0x1], 1 }

</bundles_post_ra>
